<compile_context>
chip_gen: v5e
topology: v5e:2x2
jax: 0.10.0
libtpu: 0.0.40
codegen_flags: <defaults>
</compile_context>

<pallas_src>
import jax
import jax.numpy as jnp
from jax.experimental import pallas as pl
from jax.experimental.pallas import tpu as pltpu

D_IN = 768
D_HID = 768
D_OUT = 6
N_HEADS = 6

_TILE_B_MAX = 512  # multiple of 256 (v6e MXU rows) and 128 (v5e); fits v7x 64 MiB VMEM


def _round_up(n, m):
    return ((n + m - 1) // m) * m


def qhd_head_kernel(x_ref, w1_ref, b1_ref, w2_ref, b2_ref, o_ref):
    """One (batch-tile, head) grid step: sigmoid(relu(x @ W1 + b1) @ W2 + b2).

    Shapes seen inside the kernel:
      x_ref  : (TILE_B, 768)   f32  (cast to bf16 here)
      w1_ref : (768, 768)      bf16 (head j's first-layer weight, streamed per head)
      b1_ref : (1, 1, 768)     f32
      w2_ref : (768, 6)        bf16
      b2_ref : (1, 1, 6)       f32
      o_ref  : (1, TILE_B, 6)  f32  (head j's slot of the (H, B, 6) output)
    """
    x = x_ref[...].astype(jnp.bfloat16)
    h = jnp.dot(x, w1_ref[...], preferred_element_type=jnp.float32) + b1_ref[0]
    h = jnp.maximum(h, 0.0).astype(jnp.bfloat16)  # ReLU on VPU, back to bf16 for MXU
    logits = jnp.dot(h, w2_ref[...], preferred_element_type=jnp.float32) + b2_ref[0]
    o_ref[0] = jax.nn.sigmoid(logits).astype(o_ref.dtype)


def init_params(key, seperate):
    """Deterministic f32 master weights mimicking nn.Linear's U(-1/sqrt(fan_in), ...)."""
    n_heads = N_HEADS if seperate else 1
    k1, k2, k3, k4 = jax.random.split(key, 4)
    bound1 = 1.0 / jnp.sqrt(jnp.float32(D_IN))
    bound2 = 1.0 / jnp.sqrt(jnp.float32(D_HID))
    w1 = jax.random.uniform(k1, (n_heads, D_IN, D_HID), jnp.float32, -bound1, bound1)
    b1 = jax.random.uniform(k2, (n_heads, 1, D_HID), jnp.float32, -bound1, bound1)
    w2 = jax.random.uniform(k3, (n_heads, D_HID, D_OUT), jnp.float32, -bound2, bound2)
    b2 = jax.random.uniform(k4, (n_heads, 1, D_OUT), jnp.float32, -bound2, bound2)
    return dict(w1=w1, b1=b1, w2=w2, b2=b2)


def prepare_params(params):
    """Pack per-head f32 master weights into the kernel layout (done once, outside jit).

    w1 (H,768,768) -> (768, H*768) bf16  (head j's slab at lanes [j*768, (j+1)*768))
    w2 (H,768,6)   -> (H*768, 6)   bf16  (head j's slab at rows  [j*768, (j+1)*768))
    b1 (H,1,768) / b2 (H,1,6) stay f32.
    """
    w1, b1, w2, b2 = params["w1"], params["b1"], params["w2"], params["b2"]
    H = w1.shape[0]
    w1_cat = jnp.transpose(w1, (1, 0, 2)).reshape(D_IN, H * D_HID).astype(jnp.bfloat16)
    w2_cat = w2.reshape(H * D_HID, D_OUT).astype(jnp.bfloat16)
    return dict(w1=w1_cat, b1=b1, w2=w2_cat, b2=b2)


@jax.jit
def qhd_forward(x, packed):
    """Matches QHD_Model.forward.

    packed from 6-head params (seperate=True) : (B, 768) -> (B, 36)
    packed from 1-head params (seperate=False): (B, 768) -> (B, 6)
    (Dropout in the shared branch is identity at inference.)
    """
    B = x.shape[0]
    H = packed["b1"].shape[0]

    tile_b = min(_TILE_B_MAX, _round_up(B, 16))
    b_pad = _round_up(B, tile_b)
    if b_pad != B:
        x = jnp.pad(x, ((0, b_pad - B), (0, 0)))
    n_b_tiles = b_pad // tile_b

    flops = 2 * b_pad * H * (D_IN * D_HID + D_HID * D_OUT)
    bytes_accessed = (b_pad * D_IN * 4                       # x (f32, read once per batch tile)
                      + n_b_tiles * H * D_IN * D_HID * 2     # W1 streamed per (tile, head)
                      + n_b_tiles * H * D_HID * D_OUT * 2    # W2
                      + n_b_tiles * H * (D_HID + D_OUT) * 4  # biases
                      + H * b_pad * D_OUT * 4)               # output
    cost = pl.CostEstimate(flops=int(flops),
                           transcendentals=int(b_pad * H * D_OUT),
                           bytes_accessed=int(bytes_accessed))

    out_hbd = pl.pallas_call(
        qhd_head_kernel,
        out_shape=jax.ShapeDtypeStruct((H, b_pad, D_OUT), jnp.float32),
        grid=(n_b_tiles, H),
        in_specs=[
            pl.BlockSpec((tile_b, D_IN), lambda i, j: (i, 0)),    # x: resident across heads
            pl.BlockSpec((D_IN, D_HID), lambda i, j: (0, j)),     # W1 head slab (streamed)
            pl.BlockSpec((1, 1, D_HID), lambda i, j: (j, 0, 0)),  # b1
            pl.BlockSpec((D_HID, D_OUT), lambda i, j: (j, 0)),    # W2 head slab
            pl.BlockSpec((1, 1, D_OUT), lambda i, j: (j, 0, 0)),  # b2
        ],
        out_specs=pl.BlockSpec((1, tile_b, D_OUT), lambda i, j: (j, i, 0)),
        compiler_params=pltpu.CompilerParams(
            dimension_semantics=("parallel", "arbitrary"),  # batch tiles -> both TCs on v7x
            vmem_limit_bytes=32 * 1024 * 1024,              # safe on v5e/v6e/v7x
        ),
        cost_estimate=cost,
    )(x, packed["w1"], packed["b1"], packed["w2"], packed["b2"])

    # (H, B_pad, 6) -> (B, H*6)  == torch.concat(per-head outputs, axis=1)
    out = jnp.transpose(out_hbd, (1, 0, 2)).reshape(b_pad, H * D_OUT)
    return out[:B]


def _reference(x, params):
    """Plain-JAX per-head reference applying the same bf16 weight/activation casts."""
    xb = x.astype(jnp.bfloat16)
    H = params["w1"].shape[0]
    outs = []
    for h in range(H):
        w1b = params["w1"][h].astype(jnp.bfloat16)
        w2b = params["w2"][h].astype(jnp.bfloat16)
        a = jnp.maximum(
            jnp.dot(xb, w1b, preferred_element_type=jnp.float32) + params["b1"][h], 0.0)
        outs.append(jax.nn.sigmoid(
            jnp.dot(a.astype(jnp.bfloat16), w2b, preferred_element_type=jnp.float32)
            + params["b2"][h]))
    return outs[0] if H == 1 else jnp.concatenate(outs, axis=1)


if __name__ == "__main__":
    key = jax.random.PRNGKey(0)
    kx, kp_sep, kp_shared = jax.random.split(key, 3)

    B = 8
    x = jax.random.normal(kx, (B, D_IN), jnp.float32)

    # seperate=True: 6 independent heads -> (B, 36)
    params_sep = init_params(kp_sep, seperate=True)
    packed_sep = prepare_params(params_sep)
    out_sep = jax.block_until_ready(qhd_forward(x, packed_sep))
    ref_sep = _reference(x, params_sep)
    assert out_sep.shape == (B, N_HEADS * D_OUT), out_sep.shape
    assert jnp.allclose(out_sep, ref_sep, atol=2e-3, rtol=2e-3), \
        float(jnp.max(jnp.abs(out_sep - ref_sep)))

    # seperate=False: single shared MLP (Dropout identity at inference) -> (B, 6)
    params_shared = init_params(kp_shared, seperate=False)
    packed_shared = prepare_params(params_shared)
    out_shared = jax.block_until_ready(qhd_forward(x, packed_shared))
    ref_shared = _reference(x, params_shared)
    assert out_shared.shape == (B, D_OUT), out_shared.shape
    assert jnp.allclose(out_shared, ref_shared, atol=2e-3, rtol=2e-3), \
        float(jnp.max(jnp.abs(out_shared - ref_shared)))

    # non-multiple-of-16 batch exercises the padding + row-tile path
    B2 = 40
    x2 = jax.random.normal(kx, (B2, D_IN), jnp.float32)
    out2 = jax.block_until_ready(qhd_forward(x2, packed_sep))
    ref2 = _reference(x2, params_sep)
    assert out2.shape == (B2, N_HEADS * D_OUT), out2.shape
    assert jnp.allclose(out2, ref2, atol=2e-3, rtol=2e-3), \
        float(jnp.max(jnp.abs(out2 - ref2)))

    print("KERNEL_OK")
</pallas_src>

<mosaic_0001>
module attributes {stable_mosaic.version = 11 : i64} {
  func.func @qhd_head_kernel(%arg0: i32, %arg1: i32, %arg2: memref<16x768xf32, #tpu.memory_space<vmem>>, %arg3: memref<768x768xbf16, #tpu.memory_space<vmem>>, %arg4: memref<1x1x768xf32, #tpu.memory_space<vmem>>, %arg5: memref<768x6xbf16, #tpu.memory_space<vmem>>, %arg6: memref<1x1x6xf32, #tpu.memory_space<vmem>>, %arg7: memref<1x16x6xf32, #tpu.memory_space<vmem>>) attributes {dimension_semantics = [#tpu.dimension_semantics<parallel>, #tpu.dimension_semantics<arbitrary>], iteration_bounds = array<i64: 1, 6>, scalar_prefetch = 0 : i64, scratch_operands = 0 : i64, tpu.core_type = #tpu.core_type<tc>, window_params = [{transform_indices = @transform_0, window_bounds = array<i64: 16, 768>}, {transform_indices = @transform_1, window_bounds = array<i64: 768, 768>}, {transform_indices = @transform_2, window_bounds = array<i64: 1, 1, 768>}, {transform_indices = @transform_3, window_bounds = array<i64: 768, 6>}, {transform_indices = @transform_4, window_bounds = array<i64: 1, 1, 6>}, {transform_indices = @transform_5, window_bounds = array<i64: 1, 16, 6>}]} {
    %c0 = arith.constant 0 : index
    %c0_0 = arith.constant 0 : index
    %0 = vector.load %arg2[%c0, %c0_0] : memref<16x768xf32, #tpu.memory_space<vmem>>, vector<16x768xf32>
    %1 = arith.truncf %0 : vector<16x768xf32> to vector<16x768xbf16>
    %c0_1 = arith.constant 0 : index
    %c0_2 = arith.constant 0 : index
    %2 = vector.load %arg3[%c0_1, %c0_2] : memref<768x768xbf16, #tpu.memory_space<vmem>>, vector<768x768xbf16>
    %cst = arith.constant dense<0.000000e+00> : vector<16x768xf32>
    %3 = tpu.matmul %1, %2, %cst {dimension_numbers = #tpu.dot_dimension_numbers<[1], [0], [0], [1], [0, 0, 1, 1], [], []>} : vector<16x768xbf16>, vector<768x768xbf16>, vector<16x768xf32> -> vector<16x768xf32>
    %c0_3 = arith.constant 0 : index
    %c0_4 = arith.constant 0 : index
    %c0_5 = arith.constant 0 : index
    %4 = vector.load %arg4[%c0_3, %c0_4, %c0_5] : memref<1x1x768xf32, #tpu.memory_space<vmem>>, vector<1x1x768xf32>
    %5 = vector.shape_cast %4 : vector<1x1x768xf32> to vector<1x768xf32>
    %6 = vector.broadcast %5 : vector<1x768xf32> to vector<16x768xf32>
    %7 = arith.addf %3, %6 : vector<16x768xf32>
    %cst_6 = arith.constant 0.000000e+00 : f32
    %8 = vector.broadcast %cst_6 : f32 to vector<16x768xf32>
    %9 = arith.maximumf %7, %8 : vector<16x768xf32>
    %10 = arith.truncf %9 : vector<16x768xf32> to vector<16x768xbf16>
    %c0_7 = arith.constant 0 : index
    %c0_8 = arith.constant 0 : index
    %11 = vector.load %arg5[%c0_7, %c0_8] : memref<768x6xbf16, #tpu.memory_space<vmem>>, vector<768x6xbf16>
    %cst_9 = arith.constant dense<0.000000e+00> : vector<16x6xf32>
    %12 = tpu.matmul %10, %11, %cst_9 {dimension_numbers = #tpu.dot_dimension_numbers<[1], [0], [0], [1], [0, 0, 1, 1], [], []>} : vector<16x768xbf16>, vector<768x6xbf16>, vector<16x6xf32> -> vector<16x6xf32>
    %c0_10 = arith.constant 0 : index
    %c0_11 = arith.constant 0 : index
    %c0_12 = arith.constant 0 : index
    %13 = vector.load %arg6[%c0_10, %c0_11, %c0_12] : memref<1x1x6xf32, #tpu.memory_space<vmem>>, vector<1x1x6xf32>
    %14 = vector.shape_cast %13 : vector<1x1x6xf32> to vector<1x6xf32>
    %15 = vector.broadcast %14 : vector<1x6xf32> to vector<16x6xf32>
    %16 = arith.addf %12, %15 : vector<16x6xf32>
    %17 = arith.negf %16 : vector<16x6xf32>
    %18 = math.exp %17 : vector<16x6xf32>
    %cst_13 = arith.constant 1.000000e+00 : f32
    %19 = vector.broadcast %cst_13 : f32 to vector<16x6xf32>
    %20 = arith.addf %19, %18 : vector<16x6xf32>
    %21 = arith.divf %19, %20 : vector<16x6xf32>
    %c0_14 = arith.constant 0 : index
    %c0_15 = arith.constant 0 : index
    %c0_16 = arith.constant 0 : index
    %22 = vector.load %arg7[%c0_14, %c0_15, %c0_16] : memref<1x16x6xf32, #tpu.memory_space<vmem>>, vector<1x16x6xf32>
    %23 = vector.shape_cast %22 : vector<1x16x6xf32> to vector<16x6xf32>
    %24 = vector.shape_cast %21 : vector<16x6xf32> to vector<1x16x6xf32>
    tpu.vector_store %arg7[%c0_14, %c0_15, %c0_16], %24 {strides = array<i32>} : memref<1x16x6xf32, #tpu.memory_space<vmem>>, vector<1x16x6xf32>,
    return
  }
  func.func @transform_0(%arg0: i32, %arg1: i32) -> (i32, i32) {
    %c0_i32 = arith.constant 0 : i32
    %c0_i32_0 = arith.constant 0 : i32
    return %arg0, %c0_i32 : i32, i32
  }
  func.func @transform_1(%arg0: i32, %arg1: i32) -> (i32, i32) {
    %c0_i32 = arith.constant 0 : i32
    %c0_i32_0 = arith.constant 0 : i32
    return %c0_i32, %arg1 : i32, i32
  }
  func.func @transform_2(%arg0: i32, %arg1: i32) -> (i32, i32, i32) {
    %c0_i32 = arith.constant 0 : i32
    %c0_i32_0 = arith.constant 0 : i32
    %c0_i32_1 = arith.constant 0 : i32
    return %arg1, %c0_i32, %c0_i32_0 : i32, i32, i32
  }
  func.func @transform_3(%arg0: i32, %arg1: i32) -> (i32, i32) {
    %c0_i32 = arith.constant 0 : i32
    %c0_i32_0 = arith.constant 0 : i32
    return %arg1, %c0_i32 : i32, i32
  }
  func.func @transform_4(%arg0: i32, %arg1: i32) -> (i32, i32, i32) {
    %c0_i32 = arith.constant 0 : i32
    %c0_i32_0 = arith.constant 0 : i32
    %c0_i32_1 = arith.constant 0 : i32
    return %arg1, %c0_i32, %c0_i32_0 : i32, i32, i32
  }
  func.func @transform_5(%arg0: i32, %arg1: i32) -> (i32, i32, i32) {
    %c0_i32 = arith.constant 0 : i32
    %c0_i32_0 = arith.constant 0 : i32
    return %arg1, %arg0, %c0_i32 : i32, i32, i32
  }
}

</mosaic_0001>

<bundles_post_ra>
// kernel: qhd_forward.1
= control target key start
LH: loop header
LB: loop body
LE: loop exit
PB: predicated region body
PF: predicated region fallthrough
CT: control target
= control target key end

     0   :  { %s6248_s0 = inlined_call_operand.vmem [shape: f32[16,768], index: 0, kind: input, shape index: {}]   ;;  %s6249_s1 = inlined_call_operand.hbm [shape: bf16[768,4608], index: 1, kind: input, shape index: {}]   ;;  %s6250_s2 = inlined_call_operand.hbm [shape: f32[6,1,768], index: 2, kind: input, shape index: {}]   ;;  %s6251_s3 = inlined_call_operand.vmem [shape: bf16[4608,6], index: 3, kind: input, shape index: {}]   ;;  %s6252_s4 = inlined_call_operand.hbm [shape: f32[6,1,6], index: 4, kind: input, shape index: {}]   ;;  %s6253_s5 = inlined_call_operand.vmem [shape: f32[6,16,6], index: 5, kind: output, shape index: {}]  }
   0x1   :  { %6256 = sst [smem:[#allocation11_spill]] %s6250_s2 }
   0x2   :  { %10 = vsyncpa [#allocation3], 0 }
   0x3   :  { %12 = vsyncpa [#allocation3 + $0x1], 0 }
   0x4   :  { %13 = vsyncpa [#allocation5], 0 }
   0x5   :  { %15 = vsyncpa [#allocation5 + $0x1], 0  ;;  %s5299_s18 = smov 0   ;;  %s5301_s19 = smov 0  }
   0x6   :  { %s5303_s20 = smov 0   ;;  %s5305_s21 = smov 0  }
   0x7   :  { %s5307_s22 = smov 0   ;;  %s5309_s23 = smov 0  }
   0x8 LB: > { %s6254_s24 = sadd.s32 4294967295, %s5264_s23   ;;  %s30_s25 = sadd.s32 1, %s5260_s22  ;;  %s5264_s23 = sphi %s5309_s23, %s21_s23   ;;  %s5260_s22 = sphi %s5307_s22, %s6271_s22   ;;  %s5256_s21 = sphi %s5305_s21, %s6270_s21   ;;  %s5252_s20 = sphi %s5303_s20, %s6269_s20   ;;  %s5248_s19 = sphi %s5301_s19, %s6268_s19   ;;  %s5244_s18 = sphi %s5299_s18, %s6267_s18  }
   0x9   : > { %p31_p0 = scmp.ge.s32.totalorder %s30_s25, 6  ;;  %s66_s26 = sadd.s32 1, %s5252_s20 }
   0xa   : > { %p73_p1 = scmp.ne.s32.totalorder %s5252_s20, %s5248_s19  ;;  %p74_p2 = scmp.eq.s32.totalorder %s5264_s23, 0 }
   0xb   : > { %s6273_s25 = smov (%p31_p0, %s30_s25), 0  ;;  %p79_p4 = scmp.ne.s32.totalorder %s5248_s19, %s5244_s18 }
   0xc   : > { %6257 = sst [smem:[#allocation9_spill]] %s6273_s25  ;;  %p75_p3 = por %p74_p2, %p73_p1 }
   0xd   : > { %s63_s27 = ssub.s32 %s5260_s22, %s6273_s25  ;;  %p80_p5 = scmp.eq.s32.totalorder %s6254_s24, 0 }
   0xe   : > { %p64_p6 = scmp.eq.s32.totalorder %s63_s27, 0  ;;  %p5059_p8 = scmp.lt.s32.totalorder %s5264_s23, 6 }
   0xf   : > { %p5340_p7 = por %p80_p5, %p79_p4  ;;  %s5349_s30 = sand.u32 1, %s5252_s20  }
  0x10   : > { %s5346_s29 = scalar_select %p64_p6, %s5252_s20, %s66_s26  }
  0x11   : > { %p5351_p9 = pnand %p5059_p8, %p75_p3  ;;  %s5038_s7 = smul.u32 2304, %s5349_s30 }
  0x12   : > { %6259 = sst [smem:[#allocation10_spill]] %s5346_s29  ;;  %s241_s8 = sand.u32 1, %s5264_s23  }
  0x13   : > { %s5039_s9 = smul.u32 6, %s5349_s30  ;;  %p3348_p10 = scmp.ge.s32.totalorder %s5264_s23, 1 }
  0x14   : > { %s5040_s10 = smul.u32 6, %s5260_s22  ;;  %p284_p11 = scmp.lt.s32.totalorder %s5264_s23, 7 }
  0x15   : > { %s6261_s2 = sld [smem:[#allocation11_spill]]  ;;  %s245_s14 = scalar_lea.vmem [#allocation4], %s5039_s9 }
  0x16   : > { %s253_s15 = sshll.u32 %s245_s14, 4  ;;  %p5364_p12 = pnand %p3348_p10, %p284_p11  ;;  %s254_s15 = int_to_ptr.vmem [resolvable:$true] %s253_s15 }
  0x17   : > { %s242_s18 = scalar_lea.sflag [#allocation5], %s241_s8  ;;  %s4700_s26 = smul.u32 24, %s5260_s22 }
  0x18   : > { %s223_s27 = scalar_lea.vmem [#allocation2], %s5038_s7  ;;  %s220_s14 = scalar_lea.sflag [#allocation3], %s5349_s30 }
  0x19   : > { %s231_s11 = sshll.u32 %s223_s27, 4  ;;  %s228_s9 = scalar_lea.hbm %s6249_s1, %s4700_s26  ;;  %s232_s11 = int_to_ptr.vmem [resolvable:$true] %s231_s11 }
  0x1a   : > { %s5266_s24 = smov 2304   ;;  %s5268_s25 = smov 24  }
  0x1b   : > { %s249_s13 = scalar_lea.hbm %s6261_s2, %s5040_s10  ;;  %s5267_s2 = smov 384  }
  0x1c   : > { %s251_s16 = sshll.u32 %s249_s13, 4  ;;  %s229_s13 = sshll.u32 %s228_s9, 4  ;;  %s252_s16 = int_to_ptr.hbm [resolvable:$true] %s251_s16  ;;  %s230_s13 = int_to_ptr.hbm [resolvable:$true] %s229_s13 }
  0x1d   : > { %5055 = dma.hbm_to_vmem [thread:$0]  (!%p5351_p9), %s252_s16, 96, %s254_s15, %s242_s18  }
  0x1e   : > { %5052 = dma.hbm_to_vmem [thread:$0]  (!%p5351_p9), %s230_s13, 36864, %s232_s11, %s220_s14, %s5266_s24, %s5267_s2, %s5268_s25  }
  0x1f   : > { %s275_s15 = scalar_lea.hbm %s6252_s4, %s5260_s22  ;;  %s272_s16 = scalar_lea.vmem [#allocation6], %s5349_s30 }
  0x20   : > { %s277_s7 = sshll.u32 %s275_s15, 4  ;;  %s279_s27 = sshll.u32 %s272_s16, 4  ;;  %s278_s7 = int_to_ptr.hbm [resolvable:$true] %s277_s7  ;;  %s280_s27 = int_to_ptr.vmem [resolvable:$true] %s279_s27 }
  0x21   : > { %5058 = dma.hbm_to_vmem [thread:$0]  (!%p5351_p9), %s278_s7, 16, %s280_s27, %s242_s18  }
  0x22   : > { %288 = sbr.rel (%p5364_p12) target bundleno = 649 (0x289), region = 40  ;;  %s5387_s26 = sand.u32 (!%p5364_p12), 1, %s5248_s19  }
  0x23   : > { %s5041_s2 = smul.u32 (!%p5364_p12), 2304, %s5387_s26  ;;  %s291_s24 = scalar_lea.sflag (!%p5364_p12), [#allocation3], %s5387_s26 }
  0x25   : > { %s5391_s25 = scalar_lea.vmem (!%p5364_p12), [#allocation2], %s5041_s2 }
  0x27   : > { %5235 = dma.done.wait (%p5340_p7), %s291_s24, 36864  }
  0x28   : > { %5237 = vsyncadd (%p5340_p7), %s291_s24, 4294930432  ;;  %s6263_s29 = sadd.s32 4294967295, %s5264_s23   ;;  %s5042_s6 = smul.u32 6, %s5387_s26 }
  0x29   : > { %s300_s30 = sand.u32 1, %s6263_s29  }
  0x2a   : > { %s301_s17 = scalar_lea.sflag [#allocation5], %s300_s30  ;;  %s5400_s18 = scalar_lea.vmem [#allocation4], %s5042_s6 }
  0x2b   : > { %5239 = dma.done.wait (%p5340_p7), %s301_s17, 112  }
  0x2c   : > { %5241 = vsyncadd (%p5340_p7), %s301_s17, 4294967184  ;;  %v3522_v0 = vld [vmem:[%s5391_s25 + $0x150] sm:$0xf]  ;;  %v4747_v1 = vld [vmem:[%s5391_s25 + $0x164] sm:$0xf0]  ;;  %s373_s14 = smul.u32 96, %s5256_s21 }
  0x2d   : > { %v3714_v2 = vld [vmem:[%s5391_s25 + $0x2d0] sm:$0xf]  ;;  %v3523_v3 = vor.u32 %v4747_v1, %v3522_v0  ;;  %v4795_v4 = vld [vmem:[%s5391_s25 + $0x2e4] sm:$0xf0]  ;;  %v3498_v11 = vld [vmem:[%s5391_s25 + $0x120] sm:$0xf] }
  0x2e   : > { %v3906_v5 = vld [vmem:[%s5391_s25 + $0x450] sm:$0xf]  ;;  %v4843_v6 = vld [vmem:[%s5391_s25 + $0x464] sm:$0xf0]  ;;  %v3715_v7 = vor.u32 %v4795_v4, %v3714_v2  ;;  %v4741_v13 = vld [vmem:[%s5391_s25 + $0x134] sm:$0xf0] }
  0x2f   : > { %v3907_v8 = vor.u32 %v4843_v6, %v3906_v5  ;;  %v4098_v9 = vld [vmem:[%s5391_s25 + $0x5d0] sm:$0xf]  ;;  %v4891_v10 = vld [vmem:[%s5391_s25 + $0x5e4] sm:$0xf0]  ;;  %2149 = vmatpush.bf16.msra.mxu0 %v3523_v3  ;;  %v3690_v14 = vld [vmem:[%s5391_s25 + $0x2a0] sm:$0xf]  ;;  %v3499_v16 = vor.u32 %v4741_v13, %v3498_v11 }
  0x30   : > { %v4099_v12 = vor.u32 %v4891_v10, %v4098_v9  ;;  %v4789_v15 = vld [vmem:[%s5391_s25 + $0x2b4] sm:$0xf0]  ;;  %2163 = vmatpush.bf16.msra.mxu1 %v3715_v7  ;;  %v3882_v18 = vld [vmem:[%s5391_s25 + $0x420] sm:$0xf]  ;;  %v3474_v23 = vld [vmem:[%s5391_s25 + $0xf0] sm:$0xf] }
  0x31   : > { %2177 = vmatpush.bf16.msra.mxu2 %v3907_v8  ;;  %v3691_v17 = vor.u32 %v4789_v15, %v3690_v14  ;;  %v4837_v19 = vld [vmem:[%s5391_s25 + $0x434] sm:$0xf0]  ;;  %v4074_v20 = vld [vmem:[%s5391_s25 + $0x5a0] sm:$0xf]  ;;  %v4735_v24 = vld [vmem:[%s5391_s25 + $0x104] sm:$0xf0] }
  0x32   : > { %2191 = vmatpush.bf16.msra.mxu3 %v4099_v12  ;;  %v3883_v21 = vor.u32 %v4837_v19, %v3882_v18  ;;  %v4885_v22 = vld [vmem:[%s5391_s25 + $0x5b4] sm:$0xf0]  ;;  %v3666_v26 = vld [vmem:[%s5391_s25 + $0x270] sm:$0xf]  ;;  %v4783_v27 = vld [vmem:[%s5391_s25 + $0x284] sm:$0xf0]  ;;  %v3475_v29 = vor.u32 %v4735_v24, %v3474_v23 }
  0x33   : > { %v4075_v25 = vor.u32 %v4885_v22, %v4074_v20  ;;  %v3858_v28 = vld [vmem:[%s5391_s25 + $0x3f0] sm:$0xf]  ;;  %2150 = vmatpush.bf16.msra.mxu0 %v3499_v16  ;;  %v4831_v30 = vld [vmem:[%s5391_s25 + $0x404] sm:$0xf0]  ;;  %v3667_v33 = vor.u32 %v4783_v27, %v3666_v26  ;;  %v3450_v35 = vld [vmem:[%s5391_s25 + $0xc0] sm:$0xf] }
  0x34   : > { %v4050_v31 = vld [vmem:[%s5391_s25 + $0x570] sm:$0xf]  ;;  %v4879_v32 = vld [vmem:[%s5391_s25 + $0x584] sm:$0xf0]  ;;  %2164 = vmatpush.bf16.msra.mxu1 %v3691_v17  ;;  %v3859_v34 = vor.u32 %v4831_v30, %v3858_v28  ;;  %v4729_v36 = vld [vmem:[%s5391_s25 + $0xd4] sm:$0xf0] }
  0x35   : > { %2178 = vmatpush.bf16.msra.mxu2 %v3883_v21  ;;  %v3642_v37 = vld [vmem:[%s5391_s25 + $0x240] sm:$0xf]  ;;  %v4051_v38 = vor.u32 %v4879_v32, %v4050_v31  ;;  %v4777_v39 = vld [vmem:[%s5391_s25 + $0x254] sm:$0xf0]  ;;  %v3451_v44 = vor.u32 %v4729_v36, %v3450_v35  ;;  %v3426_v47 = vld [vmem:[%s5391_s25 + $0x90] sm:$0xf] }
  0x36   : > { %2192 = vmatpush.bf16.msra.mxu3 %v4075_v25  ;;  %v3834_v40 = vld [vmem:[%s5391_s25 + $0x3c0] sm:$0xf]  ;;  %v4825_v41 = vld [vmem:[%s5391_s25 + $0x3d4] sm:$0xf0]  ;;  %v3643_v45 = vor.u32 %v4777_v39, %v3642_v37  ;;  %v4723_v48 = vld [vmem:[%s5391_s25 + $0xa4] sm:$0xf0] }
  0x37   : > { %v4026_v42 = vld [vmem:[%s5391_s25 + $0x540] sm:$0xf]  ;;  %v4873_v43 = vld [vmem:[%s5391_s25 + $0x554] sm:$0xf0]  ;;  %2151 = vmatpush.bf16.msra.mxu0 %v3475_v29  ;;  %v3835_v46 = vor.u32 %v4825_v41, %v3834_v40  ;;  %v3618_v49 = vld [vmem:[%s5391_s25 + $0x210] sm:$0xf]  ;;  %v3427_v56 = vor.u32 %v4723_v48, %v3426_v47 }
  0x38   : > { %2165 = vmatpush.bf16.msra.mxu1 %v3667_v33  ;;  %v4027_v50 = vor.u32 %v4873_v43, %v4026_v42  ;;  %v4771_v51 = vld [vmem:[%s5391_s25 + $0x224] sm:$0xf0]  ;;  %v3810_v52 = vld [vmem:[%s5391_s25 + $0x390] sm:$0xf]  ;;  %v3402_v59 = vld [vmem:[%s5391_s25 + $0x60] sm:$0xf] }
  0x39   : > { %2179 = vmatpush.bf16.msra.mxu2 %v3859_v34  ;;  %v4819_v53 = vld [vmem:[%s5391_s25 + $0x3a4] sm:$0xf0]  ;;  %v4002_v54 = vld [vmem:[%s5391_s25 + $0x510] sm:$0xf]  ;;  %v3619_v57 = vor.u32 %v4771_v51, %v3618_v49  ;;  %v4717_v60 = vld [vmem:[%s5391_s25 + $0x74] sm:$0xf0] }
  0x3a   : > { %2193 = vmatpush.bf16.msra.mxu3 %v4051_v38  ;;  %v4867_v55 = vld [vmem:[%s5391_s25 + $0x524] sm:$0xf0]  ;;  %v3811_v58 = vor.u32 %v4819_v53, %v3810_v52  ;;  %v3594_v61 = vld [vmem:[%s5391_s25 + $0x1e0] sm:$0xf]  ;;  %v4765_v63 = vld [vmem:[%s5391_s25 + $0x1f4] sm:$0xf0]  ;;  %v3403_v4 = vor.u32 %v4717_v60, %v3402_v59 }
  0x3b   : > { %2152 = vmatpush.bf16.msra.mxu0 %v3451_v44  ;;  %v4003_v62 = vor.u32 %v4867_v55, %v4002_v54  ;;  %v3786_v0 = vld [vmem:[%s5391_s25 + $0x360] sm:$0xf]  ;;  %v4813_v1 = vld [vmem:[%s5391_s25 + $0x374] sm:$0xf0]  ;;  %v3595_v5 = vor.u32 %v4765_v63, %v3594_v61  ;;  %v3378_v7 = vld [vmem:[%s5391_s25 + $0x30] sm:$0xf] }
  0x3c   : > { %2166 = vmatpush.bf16.msra.mxu1 %v3643_v45  ;;  %v3978_v2 = vld [vmem:[%s5391_s25 + $0x4e0] sm:$0xf]  ;;  %v4861_v3 = vld [vmem:[%s5391_s25 + $0x4f4] sm:$0xf0]  ;;  %v3787_v6 = vor.u32 %v4813_v1, %v3786_v0  ;;  %v4711_v8 = vld [vmem:[%s5391_s25 + $0x44] sm:$0xf0] }
  0x3d   : > { %2180 = vmatpush.bf16.msra.mxu2 %v3835_v46  ;;  %v3570_v9 = vld [vmem:[%s5391_s25 + $0x1b0] sm:$0xf]  ;;  %v3979_v10 = vor.u32 %v4861_v3, %v3978_v2  ;;  %v4759_v11 = vld [vmem:[%s5391_s25 + $0x1c4] sm:$0xf0]  ;;  %v3379_v16 = vor.u32 %v4711_v8, %v3378_v7  ;;  %v3354_v17 = vld [vmem:[%s5391_s25] sm:$0xf] }
  0x3e   : > { %2194 = vmatpush.bf16.msra.mxu3 %v4027_v50  ;;  %v3762_v12 = vld [vmem:[%s5391_s25 + $0x330] sm:$0xf]  ;;  %v4807_v13 = vld [vmem:[%s5391_s25 + $0x344] sm:$0xf0]  ;;  %v4705_v18 = vld [vmem:[%s5391_s25 + $0x14] sm:$0xf0]  ;;  %v3571_v19 = vor.u32 %v4759_v11, %v3570_v9 }
  0x3f   : > { %2153 = vmatpush.bf16.msra.mxu0 %v3427_v56  ;;  %v3954_v14 = vld [vmem:[%s5391_s25 + $0x4b0] sm:$0xf]  ;;  %v4855_v15 = vld [vmem:[%s5391_s25 + $0x4c4] sm:$0xf0]  ;;  %v3763_v20 = vor.u32 %v4807_v13, %v3762_v12  ;;  %v3546_v21 = vld [vmem:[%s5391_s25 + $0x180] sm:$0xf]  ;;  %v3355_v31 = vor.u32 %v4705_v18, %v3354_v17 }
  0x40   : > { %2167 = vmatpush.bf16.msra.mxu1 %v3619_v57  ;;  %v4753_v22 = vld [vmem:[%s5391_s25 + $0x194] sm:$0xf0]  ;;  %v3738_v23 = vld [vmem:[%s5391_s25 + $0x300] sm:$0xf]  ;;  %v3955_v24 = vor.u32 %v4855_v15, %v3954_v14  ;;  %v4290_v28 = vld [vmem:[%s5391_s25 + $0x750] sm:$0xf] }
  0x41   : > { %2181 = vmatpush.bf16.msra.mxu2 %v3811_v58  ;;  %v4801_v25 = vld [vmem:[%s5391_s25 + $0x314] sm:$0xf0]  ;;  %v3930_v26 = vld [vmem:[%s5391_s25 + $0x480] sm:$0xf]  ;;  %v4939_v29 = vld [vmem:[%s5391_s25 + $0x764] sm:$0xf0]  ;;  %v3547_v35 = vor.u32 %v4753_v22, %v3546_v21 }
  0x42   : > { %2195 = vmatpush.bf16.msra.mxu3 %v4003_v62  ;;  %v4849_v27 = vld [vmem:[%s5391_s25 + $0x494] sm:$0xf0]  ;;  %v4482_v30 = vld [vmem:[%s5391_s25 + $0x8d0] sm:$0xf]  ;;  %v4987_v32 = vld [vmem:[%s5391_s25 + $0x8e4] sm:$0xf0]  ;;  %v3739_v36 = vor.u32 %v4801_v25, %v3738_v23  ;;  %v4291_v40 = vor.u32 %v4939_v29, %v4290_v28 }
  0x43   : > { %2154 = vmatpush.bf16.msra.mxu0 %v3403_v4  ;;  %v4744_v33 = vld [vmem:[%s5391_s25 + $0x154] sm:$0xf]  ;;  %v3524_v34 = vld [vmem:[%s5391_s25 + $0x168] sm:$0xf0]  ;;  %v3931_v39 = vor.u32 %v4849_v27, %v3930_v26  ;;  %v4266_v41 = vld [vmem:[%s5391_s25 + $0x720] sm:$0xf]  ;;  %v4483_v42 = vor.u32 %v4987_v32, %v4482_v30 }
  0x44   : > { %2168 = vmatpush.bf16.msra.mxu1 %v3595_v5  ;;  %v4792_v37 = vld [vmem:[%s5391_s25 + $0x2d4] sm:$0xf]  ;;  %v3716_v38 = vld [vmem:[%s5391_s25 + $0x2e8] sm:$0xf0]  ;;  %v3527_v43 = vor.u32 %v4744_v33, %v3524_v34  ;;  %v4933_v44 = vld [vmem:[%s5391_s25 + $0x734] sm:$0xf0] }
  0x45   : > { %2182 = vmatpush.bf16.msra.mxu2 %v3787_v6  ;;  %v4458_v45 = vld [vmem:[%s5391_s25 + $0x8a0] sm:$0xf]  ;;  %v4981_v46 = vld [vmem:[%s5391_s25 + $0x8b4] sm:$0xf0]  ;;  %v3719_v47 = vor.u32 %v4792_v37, %v3716_v38  ;;  %v4738_v48 = vld [vmem:[%s5391_s25 + $0x124] sm:$0xf]  ;;  %v4267_v54 = vor.u32 %v4933_v44, %v4266_v41 }
  0x46   : > { %2196 = vmatpush.bf16.msra.mxu3 %v3979_v10  ;;  %v3500_v49 = vld [vmem:[%s5391_s25 + $0x138] sm:$0xf0]  ;;  %v4786_v50 = vld [vmem:[%s5391_s25 + $0x2a4] sm:$0xf]  ;;  %v395_v53 = vld [vmem:[%s6248_s0 + $0x30] sm:$0xff]  ;;  %v4459_v58 = vor.u32 %v4981_v46, %v4458_v45  ;;  %p6083_p13 = scmp.lt.s32.totalorder %s373_s14, 575 }
  0x47   : > { %2155 = vmatpush.bf16.msra.mxu0 %v3379_v16  ;;  %v3692_v51 = vld [vmem:[%s5391_s25 + $0x2b8] sm:$0xf0]  ;;  %v389_v52 = vld [vmem:[%s6248_s0] sm:$0xff]  ;;  %v4242_v55 = vld [vmem:[%s5391_s25 + $0x6f0] sm:$0xf]  ;;  %v3503_v59 = vor.u32 %v4738_v48, %v3500_v49  ;;  %p380_p0 = scmp.lt.s32.totalorder %s5256_s21, 5 }
  0x48   : > { %2169 = vmatpush.bf16.msra.mxu1 %v3571_v19  ;;  %v4927_v56 = vld [vmem:[%s5391_s25 + $0x704] sm:$0xf0]  ;;  %v5494_v57 = vpack.c.bf16 %v395_v53, %v389_v52  ;;  %v4434_v60 = vld [vmem:[%s5391_s25 + $0x870] sm:$0xf]  ;;  %v4732_v62 = vld [vmem:[%s5391_s25 + $0xf4] sm:$0xf]  ;;  %v3695_v63 = vor.u32 %v4786_v50, %v3692_v51 }
  0x49   : > { %2183 = vmatpush.bf16.msra.mxu2 %v3763_v20  ;;  %v4975_v61 = vld [vmem:[%s5391_s25 + $0x884] sm:$0xf0]  ;;  %v3476_v0 = vld [vmem:[%s5391_s25 + $0x108] sm:$0xf0]  ;;  %v396_v2 = vld [vmem:[%s6248_s0 + $0x38] sm:$0xff]  ;;  %v4243_v7 = vor.u32 %v4927_v56, %v4242_v55  ;;  %s6275_s14 = smov (!%p6083_p13, %s373_s14), 575 }
  0x4a   : > { %2197 = vmatpush.bf16.msra.mxu3 %v3955_v24  ;;  %v390_v1 = vld [vmem:[%s6248_s0 + $0x8] sm:$0xff]  ;;  %v4780_v3 = vld [vmem:[%s5391_s25 + $0x274] sm:$0xf]  ;;  %v4218_v5 = vld [vmem:[%s5391_s25 + $0x6c0] sm:$0xf]  ;;  %v4435_v11 = vor.u32 %v4975_v61, %v4434_v60  ;;  %v3479_v12 = vor.u32 %v4732_v62, %v3476_v0  ;;  %s3349_s15 = sshll.u32 %s6275_s14, 2 }
  0x4b   : > { %2156 = vmatpush.bf16.msra.mxu0 %v3355_v31  ;;  %v3668_v4 = vld [vmem:[%s5391_s25 + $0x288] sm:$0xf0]  ;;  %v5510_v6 = vpack.c.bf16 %v396_v2, %v390_v1  ;;  %v4921_v8 = vld [vmem:[%s5391_s25 + $0x6d4] sm:$0xf0]  ;;  %v4410_v9 = vld [vmem:[%s5391_s25 + $0x840] sm:$0xf]  ;;  %s6131_s27 = scalar_lea.vmem %s6251_s3, %s3349_s15 }
  0x4c   : > { %2170 = vmatpush.bf16.msra.mxu1 %v3547_v35  ;;  %v4969_v10 = vld [vmem:[%s5391_s25 + $0x854] sm:$0xf0]  ;;  %v4726_v13 = vld [vmem:[%s5391_s25 + $0xc4] sm:$0xf]  ;;  %v3452_v14 = vld [vmem:[%s5391_s25 + $0xd8] sm:$0xf0]  ;;  %v3671_v16 = vor.u32 %v4780_v3, %v3668_v4  ;;  %v4219_v24 = vor.u32 %v4921_v8, %v4218_v5 }
  0x4d   : > { %2184 = vmatpush.bf16.msra.mxu2 %v3739_v36  ;;  %v391_v15 = vld [vmem:[%s6248_s0 + $0x10] sm:$0xff]  ;;  %v397_v17 = vld [vmem:[%s6248_s0 + $0x40] sm:$0xff]  ;;  %v392_v18 = vld [vmem:[%s6248_s0 + $0x18] sm:$0xff]  ;;  %v4411_v25 = vor.u32 %v4969_v10, %v4410_v9  ;;  %v3455_v26 = vor.u32 %v4726_v13, %v3452_v14  ;;  %s6277_s21 = smov (!%p380_p0, %s5256_s21), 5  ;;  %vm3181_vm3 = vcmask 48128  }
  0x4e   : > { %2198 = vmatpush.bf16.msra.mxu3 %v3931_v39  ;;  %2157 = vmatmul.bf16.vlgmr.msra.gmra.mxu0 %v5494_v57  ;;  %v398_v19 = vld [vmem:[%s6248_s0 + $0x48] sm:$0xff]  ;;  %v4774_v20 = vld [vmem:[%s5391_s25 + $0x244] sm:$0xf]  ;;  %v3644_v21 = vld [vmem:[%s5391_s25 + $0x258] sm:$0xf0]  ;;  %v5532_v22 = vpack.c.bf16 %v397_v17, %v391_v15 }
  0x4f   : > { %2205 = vmatpush.bf16.msrb.mxu0 %v4291_v40  ;;  %2171 = vmatmul.bf16.vlgmr.msra.gmra.mxu1 %v5510_v6  ;;  %v5534_v23 = vpack.c.bf16 %v398_v19, %v392_v18  ;;  %v4194_v27 = vld [vmem:[%s5391_s25 + $0x690] sm:$0xf]  ;;  %v4915_v28 = vld [vmem:[%s5391_s25 + $0x6a4] sm:$0xf0]  ;;  %v3647_v30 = vor.u32 %v4774_v20, %v3644_v21  ;;  %v4720_v32 = vld [vmem:[%s5391_s25 + $0x94] sm:$0xf] }
  0x50   : > { %2219 = vmatpush.bf16.msrb.mxu1 %v4483_v42  ;;  %v4386_v29 = vld [vmem:[%s5391_s25 + $0x810] sm:$0xf]  ;;  %v4963_v31 = vld [vmem:[%s5391_s25 + $0x824] sm:$0xf0]  ;;  %v3428_v33 = vld [vmem:[%s5391_s25 + $0xa8] sm:$0xf0]  ;;  %2185 = vmatmul.bf16.vlgmr.msra.gmra.mxu2 %v5532_v22  ;;  %v4195_v36 = vor.u32 %v4915_v28, %v4194_v27 }
  0x51   : > { %2233 = vmatpush.bf16.msrb.mxu2 %v3527_v43  ;;  %v4768_v34 = vld [vmem:[%s5391_s25 + $0x214] sm:$0xf]  ;;  %v3620_v35 = vld [vmem:[%s5391_s25 + $0x228] sm:$0xf0]  ;;  %2199 = vmatmul.bf16.vlgmr.msra.gmra.mxu3 %v5534_v23  ;;  %v4387_v37 = vor.u32 %v4963_v31, %v4386_v29  ;;  %v3431_v38 = vor.u32 %v4720_v32, %v3428_v33  ;;  %v4170_v39 = vld [vmem:[%s5391_s25 + $0x660] sm:$0xf] }
  0x52   : > { %2247 = vmatpush.bf16.msrb.mxu3 %v3719_v47  ;;  %v4909_v40 = vld [vmem:[%s5391_s25 + $0x674] sm:$0xf0]  ;;  %v4362_v41 = vld [vmem:[%s5391_s25 + $0x7e0] sm:$0xf]  ;;  %v3623_v42 = vor.u32 %v4768_v34, %v3620_v35  ;;  %v4714_v44 = vld [vmem:[%s5391_s25 + $0x64] sm:$0xf] }
  0x53   : > { %2206 = vmatpush.bf16.msrb.mxu0 %v4267_v54  ;;  %v4957_v43 = vld [vmem:[%s5391_s25 + $0x7f4] sm:$0xf0]  ;;  %v3404_v45 = vld [vmem:[%s5391_s25 + $0x78] sm:$0xf0]  ;;  %v4762_v46 = vld [vmem:[%s5391_s25 + $0x1e4] sm:$0xf]  ;;  %v4171_v48 = vor.u32 %v4909_v40, %v4170_v39 }
  0x54   : > { %2220 = vmatpush.bf16.msrb.mxu1 %v4459_v58  ;;  %v3596_v47 = vld [vmem:[%s5391_s25 + $0x1f8] sm:$0xf0]  ;;  %v4363_v49 = vor.u32 %v4957_v43, %v4362_v41  ;;  %v3407_v50 = vor.u32 %v4714_v44, %v3404_v45  ;;  %v4146_v51 = vld [vmem:[%s5391_s25 + $0x630] sm:$0xf]  ;;  %v4903_v52 = vld [vmem:[%s5391_s25 + $0x644] sm:$0xf0] }
  0x55   : > { %2234 = vmatpush.bf16.msrb.mxu2 %v3503_v59  ;;  %v4338_v53 = vld [vmem:[%s5391_s25 + $0x7b0] sm:$0xf]  ;;  %v3599_v54 = vor.u32 %v4762_v46, %v3596_v47  ;;  %v4951_v55 = vld [vmem:[%s5391_s25 + $0x7c4] sm:$0xf0]  ;;  %v4708_v56 = vld [vmem:[%s5391_s25 + $0x34] sm:$0xf]  ;;  %v4147_v61 = vor.u32 %v4903_v52, %v4146_v51 }
  0x56   : > { %2248 = vmatpush.bf16.msrb.mxu3 %v3695_v63  ;;  %v3380_v58 = vld [vmem:[%s5391_s25 + $0x48] sm:$0xf0]  ;;  %v4756_v59 = vld [vmem:[%s5391_s25 + $0x1b4] sm:$0xf]  ;;  %v4122_v62 = vld [vmem:[%s5391_s25 + $0x600] sm:$0xf]  ;;  %v4339_v1 = vor.u32 %v4951_v55, %v4338_v53 }
  0x57   : > { %2207 = vmatpush.bf16.msrb.mxu0 %v4243_v7  ;;  %v3572_v60 = vld [vmem:[%s5391_s25 + $0x1c8] sm:$0xf0]  ;;  %v4897_v63 = vld [vmem:[%s5391_s25 + $0x614] sm:$0xf0]  ;;  %v4314_v0 = vld [vmem:[%s5391_s25 + $0x780] sm:$0xf]  ;;  %v3383_v2 = vor.u32 %v4708_v56, %v3380_v58 }
  0x58   : > { %2221 = vmatpush.bf16.msrb.mxu1 %v4435_v11  ;;  %v4945_v3 = vld [vmem:[%s5391_s25 + $0x794] sm:$0xf0]  ;;  %v4702_v4 = vld [vmem:[%s5391_s25 + $0x4] sm:$0xf]  ;;  %v3356_v5 = vld [vmem:[%s5391_s25 + $0x18] sm:$0xf0]  ;;  %v3575_v7 = vor.u32 %v4756_v59, %v3572_v60  ;;  %v4123_v14 = vor.u32 %v4897_v63, %v4122_v62 }
  0x59   : > { %2235 = vmatpush.bf16.msrb.mxu2 %v3479_v12  ;;  %v4750_v8 = vld [vmem:[%s5391_s25 + $0x184] sm:$0xf]  ;;  %v3548_v9 = vld [vmem:[%s5391_s25 + $0x198] sm:$0xf0]  ;;  %v4840_v10 = vld [vmem:[%s5391_s25 + $0x454] sm:$0xf]  ;;  %v4315_v18 = vor.u32 %v4945_v3, %v4314_v0  ;;  %v3359_v19 = vor.u32 %v4702_v4, %v3356_v5 }
  0x5a   : > { %2249 = vmatpush.bf16.msrb.mxu3 %v3671_v16  ;;  %v3908_v11 = vld [vmem:[%s5391_s25 + $0x468] sm:$0xf0]  ;;  %v4888_v12 = vld [vmem:[%s5391_s25 + $0x5d4] sm:$0xf]  ;;  %v393_v21 = vld [vmem:[%s6248_s0 + $0x20] sm:$0xff] }
  0x5b   : > { %2208 = vmatpush.bf16.msrb.mxu0 %v4219_v24  ;;  %v4100_v13 = vld [vmem:[%s5391_s25 + $0x5e8] sm:$0xf0]  ;;  %v4936_v15 = vld [vmem:[%s5391_s25 + $0x754] sm:$0xf]  ;;  %v400_v28 = vld [vmem:[%s6248_s0 + $0x58] sm:$0xff] }
  0x5c   : > { %2222 = vmatpush.bf16.msrb.mxu1 %v4411_v25  ;;  %v4292_v16 = vld [vmem:[%s5391_s25 + $0x768] sm:$0xf0]  ;;  %v4984_v17 = vld [vmem:[%s5391_s25 + $0x8d4] sm:$0xf]  ;;  %v3551_v25 = vor.u32 %v4750_v8, %v3548_v9  ;;  %v4103_v29 = vor.u32 %v4888_v12, %v4100_v13  ;;  %v4834_v31 = vld [vmem:[%s5391_s25 + $0x424] sm:$0xf] }
  0x5d   : > { %2236 = vmatpush.bf16.msrb.mxu2 %v3455_v26  ;;  %v4484_v20 = vld [vmem:[%s5391_s25 + $0x8e8] sm:$0xf0]  ;;  %v399_v24 = vld [vmem:[%s6248_s0 + $0x50] sm:$0xff]  ;;  %v3911_v26 = vor.u32 %v4840_v10, %v3908_v11  ;;  %v3884_v32 = vld [vmem:[%s5391_s25 + $0x438] sm:$0xf0] }
  0x5e   : > { %2250 = vmatpush.bf16.msrb.mxu3 %v3647_v30  ;;  %v394_v27 = vld [vmem:[%s6248_s0 + $0x28] sm:$0xff]  ;;  %v4295_v30 = vor.u32 %v4936_v15, %v4292_v16  ;;  %v4882_v33 = vld [vmem:[%s5391_s25 + $0x5a4] sm:$0xf]  ;;  %v4487_v34 = vor.u32 %v4984_v17, %v4484_v20  ;;  %v5593_v35 = vpack.c.bf16 %v399_v24, %v393_v21  ;;  %v4460_v41 = vld [vmem:[%s5391_s25 + $0x8b8] sm:$0xf0] }
  0x5f   : > { %2209 = vmatpush.bf16.msrb.mxu0 %v4195_v36  ;;  %v4076_v36 = vld [vmem:[%s5391_s25 + $0x5b8] sm:$0xf0]  ;;  %v5598_v39 = vpack.c.bf16 %v400_v28, %v394_v27  ;;  %v4978_v40 = vld [vmem:[%s5391_s25 + $0x8a4] sm:$0xf]  ;;  %v4828_v45 = vld [vmem:[%s5391_s25 + $0x3f4] sm:$0xf] }
  0x60   : > { %2223 = vmatpush.bf16.msrb.mxu1 %v4387_v37  ;;  %v4930_v37 = vld [vmem:[%s5391_s25 + $0x724] sm:$0xf]  ;;  %v4079_v43 = vor.u32 %v4882_v33, %v4076_v36  ;;  %v3860_v46 = vld [vmem:[%s5391_s25 + $0x408] sm:$0xf0]  ;;  %v4876_v47 = vld [vmem:[%s5391_s25 + $0x574] sm:$0xf] }
  0x61   : > { %2237 = vmatpush.bf16.msrb.mxu2 %v3431_v38  ;;  %v4268_v38 = vld [vmem:[%s5391_s25 + $0x738] sm:$0xf0]  ;;  %v4244_v51 = vld [vmem:[%s5391_s25 + $0x708] sm:$0xf0]  ;;  %v4972_v52 = vld [vmem:[%s5391_s25 + $0x874] sm:$0xf] }
  0x62   : > { %2251 = vmatpush.bf16.msrb.mxu3 %v3623_v42  ;;  %v3887_v42 = vor.u32 %v4834_v31, %v3884_v32  ;;  %v4271_v44 = vor.u32 %v4930_v37, %v4268_v38  ;;  %v4436_v53 = vld [vmem:[%s5391_s25 + $0x888] sm:$0xf0]  ;;  %v4822_v58 = vld [vmem:[%s5391_s25 + $0x3c4] sm:$0xf]  ;;  %v3836_v59 = vld [vmem:[%s5391_s25 + $0x3d8] sm:$0xf0] }
  0x63   : > { %2210 = vmatpush.bf16.msrb.mxu0 %v4171_v48  ;;  %v4463_v48 = vor.u32 %v4978_v40, %v4460_v41  ;;  %v4870_v60 = vld [vmem:[%s5391_s25 + $0x544] sm:$0xf]  ;;  %v4028_v62 = vld [vmem:[%s5391_s25 + $0x558] sm:$0xf0]  ;;  %v3839_v3 = vor.u32 %v4822_v58, %v3836_v59  ;;  %v3812_v8 = vld [vmem:[%s5391_s25 + $0x3a8] sm:$0xf0] }
  0x64   : > { %2224 = vmatpush.bf16.msrb.mxu1 %v4363_v49  ;;  %v4052_v49 = vld [vmem:[%s5391_s25 + $0x588] sm:$0xf0]  ;;  %v4918_v63 = vld [vmem:[%s5391_s25 + $0x6c4] sm:$0xf]  ;;  %v4220_v0 = vld [vmem:[%s5391_s25 + $0x6d8] sm:$0xf0]  ;;  %v4031_v4 = vor.u32 %v4870_v60, %v4028_v62 }
  0x65   : > { %2238 = vmatpush.bf16.msrb.mxu2 %v3407_v50  ;;  %v4924_v50 = vld [vmem:[%s5391_s25 + $0x6f4] sm:$0xf]  ;;  %v4055_v55 = vor.u32 %v4876_v47, %v4052_v49  ;;  %v4223_v5 = vor.u32 %v4918_v63, %v4220_v0  ;;  %v4004_v11 = vld [vmem:[%s5391_s25 + $0x528] sm:$0xf0]  ;;  %v3788_v20 = vld [vmem:[%s5391_s25 + $0x378] sm:$0xf0] }
  0x66   : > { %2252 = vmatpush.bf16.msrb.mxu3 %v3599_v54  ;;  %v3863_v54 = vor.u32 %v4828_v45, %v3860_v46  ;;  %v4247_v56 = vor.u32 %v4924_v50, %v4244_v51  ;;  %v4864_v9 = vld [vmem:[%s5391_s25 + $0x514] sm:$0xf]  ;;  %v4196_v13 = vld [vmem:[%s5391_s25 + $0x6a8] sm:$0xf0]  ;;  %v4858_v21 = vld [vmem:[%s5391_s25 + $0x4e4] sm:$0xf] }
  0x67   : > { %2211 = vmatpush.bf16.msrb.mxu0 %v4147_v61  ;;  %v4439_v61 = vor.u32 %v4972_v52, %v4436_v53  ;;  %v4912_v12 = vld [vmem:[%s5391_s25 + $0x694] sm:$0xf]  ;;  %v4388_v15 = vld [vmem:[%s5391_s25 + $0x828] sm:$0xf0]  ;;  %v4007_v17 = vor.u32 %v4864_v9, %v4004_v11  ;;  %v4172_v27 = vld [vmem:[%s5391_s25 + $0x678] sm:$0xf0] }
  0x68   : > { %2225 = vmatpush.bf16.msrb.mxu1 %v4339_v1  ;;  %v4966_v1 = vld [vmem:[%s5391_s25 + $0x844] sm:$0xf]  ;;  %v4804_v33 = vld [vmem:[%s5391_s25 + $0x334] sm:$0xf]  ;;  %v3956_v38 = vld [vmem:[%s5391_s25 + $0x4c8] sm:$0xf0] }
  0x69   : > { %2239 = vmatpush.bf16.msrb.mxu2 %v3383_v2  ;;  %v4412_v2 = vld [vmem:[%s5391_s25 + $0x858] sm:$0xf0]  ;;  %v4954_v28 = vld [vmem:[%s5391_s25 + $0x7e4] sm:$0xf]  ;;  %v4852_v36 = vld [vmem:[%s5391_s25 + $0x4b4] sm:$0xf] }
  0x6a   : > { %2253 = vmatpush.bf16.msrb.mxu3 %v3575_v7  ;;  %v4816_v7 = vld [vmem:[%s5391_s25 + $0x394] sm:$0xf]  ;;  %v4415_v10 = vor.u32 %v4966_v1, %v4412_v2  ;;  %v4148_v41 = vld [vmem:[%s5391_s25 + $0x648] sm:$0xf0]  ;;  %v4798_v45 = vld [vmem:[%s5391_s25 + $0x304] sm:$0xf]  ;;  %v3959_v47 = vor.u32 %v4852_v36, %v3956_v38 }
  0x6b   : > { %2212 = vmatpush.bf16.msrb.mxu0 %v4123_v14  ;;  %v4960_v14 = vld [vmem:[%s5391_s25 + $0x814] sm:$0xf]  ;;  %v3815_v16 = vor.u32 %v4816_v7, %v3812_v8  ;;  %v3740_v46 = vld [vmem:[%s5391_s25 + $0x318] sm:$0xf0]  ;;  %v4846_v49 = vld [vmem:[%s5391_s25 + $0x484] sm:$0xf] }
  0x6c   : > { %2226 = vmatpush.bf16.msrb.mxu1 %v4315_v18  ;;  %v4199_v18 = vor.u32 %v4912_v12, %v4196_v13  ;;  %v4391_v24 = vor.u32 %v4960_v14, %v4388_v15  ;;  %v4900_v40 = vld [vmem:[%s5391_s25 + $0x634] sm:$0xf]  ;;  %v3932_v50 = vld [vmem:[%s5391_s25 + $0x498] sm:$0xf0]  ;;  %v4894_v51 = vld [vmem:[%s5391_s25 + $0x604] sm:$0xf]  ;;  %v3743_v60 = vor.u32 %v4798_v45, %v3740_v46 }
  0x6d   : > { %2240 = vmatpush.bf16.msrb.mxu2 %v3359_v19  ;;  %v4810_v19 = vld [vmem:[%s5391_s25 + $0x364] sm:$0xf]  ;;  %v4124_v53 = vld [vmem:[%s5391_s25 + $0x618] sm:$0xf0]  ;;  %v4748_v58 = vld [vmem:[%s5391_s25 + $0x16c] sm:$0xf0]  ;;  %v3935_v0 = vor.u32 %v4846_v49, %v3932_v50 }
  0x6e   : > { %2254 = vmatpush.bf16.msrb.mxu3 %v3551_v25  ;;  %2213 = vmatmul.bf16.vlgmr.msrb.gmra.mxu0 %v5593_v35  ;;  %v3980_v25 = vld [vmem:[%s5391_s25 + $0x4f8] sm:$0xf0]  ;;  %v3722_v59 = vld [vmem:[%s5391_s25 + $0x2d8] sm:$0xf]  ;;  %v4844_v63 = vld [vmem:[%s5391_s25 + $0x46c] sm:$0xf0]  ;;  %v4127_v1 = vor.u32 %v4894_v51, %v4124_v53 }
  0x6f   : > { %2261 = vmatpush.bf16.msra.mxu0 %v3911_v26  ;;  %2227 = vmatmul.bf16.vlgmr.msrb.gmra.mxu1 %v5598_v39  ;;  %v4906_v26 = vld [vmem:[%s5391_s25 + $0x664] sm:$0xf]  ;;  %v3983_v31 = vor.u32 %v4858_v21, %v3980_v25  ;;  %v3914_v62 = vld [vmem:[%s5391_s25 + $0x458] sm:$0xf]  ;;  %v3506_v9 = vld [vmem:[%s5391_s25 + $0x128] sm:$0xf] }
  0x70   : > { %2275 = vmatpush.bf16.msra.mxu1 %v4103_v29  ;;  %2241 = vmatmul.bf16.vlgmr.msrb.gmra.mxu2 %v5494_v57  ;;  %v4364_v29 = vld [vmem:[%s5391_s25 + $0x7f8] sm:$0xf0]  ;;  %v4175_v32 = vor.u32 %v4906_v26, %v4172_v27  ;;  %v4106_v2 = vld [vmem:[%s5391_s25 + $0x5d8] sm:$0xf]  ;;  %v3915_v8 = vor.u32 %v4844_v63, %v3914_v62  ;;  %v3698_v11 = vld [vmem:[%s5391_s25 + $0x2a8] sm:$0xf] }
  0x71   : > { %2289 = vmatpush.bf16.msra.mxu2 %v4295_v30  ;;  %2255 = vmatmul.bf16.vlgmr.msrb.gmra.mxu3 %v5510_v6  ;;  %v3791_v30 = vor.u32 %v4810_v19, %v3788_v20  ;;  %v4367_v37 = vor.u32 %v4954_v28, %v4364_v29  ;;  %v4790_v13 = vld [vmem:[%s5391_s25 + $0x2bc] sm:$0xf0]  ;;  %v3890_v14 = vld [vmem:[%s5391_s25 + $0x428] sm:$0xf]  ;;  %v3482_v21 = vld [vmem:[%s5391_s25 + $0xf8] sm:$0xf] }
  0x72   : > { %2303 = vmatpush.bf16.msra.mxu3 %v4487_v34  ;;  %v3764_v34 = vld [vmem:[%s5391_s25 + $0x348] sm:$0xf0]  ;;  %v4838_v15 = vld [vmem:[%s5391_s25 + $0x43c] sm:$0xf0]  ;;  %v3699_v19 = vor.u32 %v4790_v13, %v3698_v11  ;;  %v3674_v25 = vld [vmem:[%s5391_s25 + $0x278] sm:$0xf] }
  0x73   : > { %2262 = vmatpush.bf16.msra.mxu0 %v3887_v42  ;;  %v4948_v42 = vld [vmem:[%s5391_s25 + $0x7b4] sm:$0xf]  ;;  %v3891_v20 = vor.u32 %v4838_v15, %v3890_v14  ;;  %v4784_v27 = vld [vmem:[%s5391_s25 + $0x28c] sm:$0xf0]  ;;  %v3866_v28 = vld [vmem:[%s5391_s25 + $0x3f8] sm:$0xf] }
  0x74   : > { %2276 = vmatpush.bf16.msra.mxu1 %v4079_v43  ;;  %v4340_v43 = vld [vmem:[%s5391_s25 + $0x7c8] sm:$0xf0]  ;;  %v4832_v29 = vld [vmem:[%s5391_s25 + $0x40c] sm:$0xf0]  ;;  %v3458_v36 = vld [vmem:[%s5391_s25 + $0xc8] sm:$0xf] }
  0x75   : > { %2290 = vmatpush.bf16.msra.mxu2 %v4271_v44  ;;  %v3767_v44 = vor.u32 %v4804_v33, %v3764_v34  ;;  %v4343_v52 = vor.u32 %v4948_v42, %v4340_v43  ;;  %v3675_v33 = vor.u32 %v4784_v27, %v3674_v25  ;;  %v3867_v34 = vor.u32 %v4832_v29, %v3866_v28  ;;  %v3650_v38 = vld [vmem:[%s5391_s25 + $0x248] sm:$0xf]  ;;  %v4826_v43 = vld [vmem:[%s5391_s25 + $0x3dc] sm:$0xf0]  ;;  %v3434_v49 = vld [vmem:[%s5391_s25 + $0x98] sm:$0xf] }
  0x76   : > { %2304 = vmatpush.bf16.msra.mxu3 %v4463_v48  ;;  %v4151_v48 = vor.u32 %v4900_v40, %v4148_v41  ;;  %v4778_v41 = vld [vmem:[%s5391_s25 + $0x25c] sm:$0xf0]  ;;  %v3842_v42 = vld [vmem:[%s5391_s25 + $0x3c8] sm:$0xf]  ;;  %v4724_v50 = vld [vmem:[%s5391_s25 + $0xac] sm:$0xf0] }
  0x77   : > { %2263 = vmatpush.bf16.msra.mxu0 %v3863_v54  ;;  %v4942_v54 = vld [vmem:[%s5391_s25 + $0x784] sm:$0xf]  ;;  %v4874_v45 = vld [vmem:[%s5391_s25 + $0x55c] sm:$0xf0]  ;;  %v3626_v51 = vld [vmem:[%s5391_s25 + $0x218] sm:$0xf] }
  0x78   : > { %2277 = vmatpush.bf16.msra.mxu1 %v4055_v55  ;;  %v4316_v55 = vld [vmem:[%s5391_s25 + $0x798] sm:$0xf0]  ;;  %v4772_v53 = vld [vmem:[%s5391_s25 + $0x22c] sm:$0xf0]  ;;  %v3410_v62 = vld [vmem:[%s5391_s25 + $0x68] sm:$0xf] }
  0x79   : > { %2291 = vmatpush.bf16.msra.mxu2 %v4247_v56  ;;  %v3530_v56 = vld [vmem:[%s5391_s25 + $0x158] sm:$0xf]  ;;  %v4718_v63 = vld [vmem:[%s5391_s25 + $0x7c] sm:$0xf0]  ;;  %v4760_v15 = vld [vmem:[%s5391_s25 + $0x1cc] sm:$0xf0] }
  0x7a   : > { %2305 = vmatpush.bf16.msra.mxu3 %v4439_v61  ;;  %v4796_v61 = vld [vmem:[%s5391_s25 + $0x2ec] sm:$0xf0]  ;;  %v3386_v11 = vld [vmem:[%s5391_s25 + $0x38] sm:$0xf]  ;;  %v3554_v27 = vld [vmem:[%s5391_s25 + $0x188] sm:$0xf] }
  0x7b   : > { %2264 = vmatpush.bf16.msra.mxu0 %v3839_v3  ;;  %v4892_v3 = vld [vmem:[%s5391_s25 + $0x5ec] sm:$0xf0]  ;;  %v3723_v7 = vor.u32 %v4796_v61, %v3722_v59  ;;  %v3435_v59 = vor.u32 %v4724_v50, %v3434_v49  ;;  %v3578_v13 = vld [vmem:[%s5391_s25 + $0x1b8] sm:$0xf]  ;;  %v4754_v28 = vld [vmem:[%s5391_s25 + $0x19c] sm:$0xf0] }
  0x7c   : > { %2278 = vmatpush.bf16.msra.mxu1 %v4031_v4  ;;  %v4319_v4 = vor.u32 %v4942_v54, %v4316_v55  ;;  %v4107_v12 = vor.u32 %v4892_v3, %v4106_v2  ;;  %v3818_v54 = vld [vmem:[%s5391_s25 + $0x398] sm:$0xf]  ;;  %v4820_v55 = vld [vmem:[%s5391_s25 + $0x3ac] sm:$0xf0]  ;;  %v4766_v2 = vld [vmem:[%s5391_s25 + $0x1fc] sm:$0xf0]  ;;  %v3579_v25 = vor.u32 %v4760_v15, %v3578_v13 }
  0x7d   : > { %2292 = vmatpush.bf16.msra.mxu2 %v4223_v5  ;;  %v3531_v5 = vor.u32 %v4748_v58, %v3530_v56  ;;  %v4010_v56 = vld [vmem:[%s5391_s25 + $0x518] sm:$0xf]  ;;  %v4868_v58 = vld [vmem:[%s5391_s25 + $0x52c] sm:$0xf0]  ;;  %v3819_v61 = vor.u32 %v4820_v55, %v3818_v54  ;;  %v3794_v3 = vld [vmem:[%s5391_s25 + $0x368] sm:$0xf] }
  0x7e   : > { %2306 = vmatpush.bf16.msra.mxu3 %v4415_v10  ;;  %v4742_v10 = vld [vmem:[%s5391_s25 + $0x13c] sm:$0xf0]  ;;  %v3746_v29 = vld [vmem:[%s5391_s25 + $0x308] sm:$0xf] }
  0x7f   : > { %2265 = vmatpush.bf16.msra.mxu0 %v3815_v16  ;;  %v4082_v16 = vld [vmem:[%s5391_s25 + $0x5a8] sm:$0xf]  ;;  %v4982_v55 = vld [vmem:[%s5391_s25 + $0x8bc] sm:$0xf0] }
  0x80   : > { %2279 = vmatpush.bf16.msra.mxu1 %v4007_v17  ;;  %v4886_v17 = vld [vmem:[%s5391_s25 + $0x5bc] sm:$0xf0]  ;;  %v4226_v13 = vld [vmem:[%s5391_s25 + $0x6c8] sm:$0xf] }
  0x81   : > { %2293 = vmatpush.bf16.msra.mxu2 %v4199_v18  ;;  %v3507_v18 = vor.u32 %v4742_v10, %v3506_v9  ;;  %v4083_v26 = vor.u32 %v4886_v17, %v4082_v16  ;;  %v3770_v16 = vld [vmem:[%s5391_s25 + $0x338] sm:$0xf]  ;;  %v4808_v17 = vld [vmem:[%s5391_s25 + $0x34c] sm:$0xf0]  ;;  %v4418_v15 = vld [vmem:[%s5391_s25 + $0x848] sm:$0xf] }
  0x82   : > { %2307 = vmatpush.bf16.msra.mxu3 %v4391_v24  ;;  %v4736_v24 = vld [vmem:[%s5391_s25 + $0x10c] sm:$0xf0] }
  0x83   : > { %2266 = vmatpush.bf16.msra.mxu0 %v3791_v30  ;;  %v4058_v30 = vld [vmem:[%s5391_s25 + $0x578] sm:$0xf] }
  0x84   : > { %2280 = vmatpush.bf16.msra.mxu1 %v3983_v31  ;;  %v4880_v31 = vld [vmem:[%s5391_s25 + $0x58c] sm:$0xf0] }
  0x85   : > { %2294 = vmatpush.bf16.msra.mxu2 %v4175_v32  ;;  %v3483_v32 = vor.u32 %v4736_v24, %v3482_v21  ;;  %v4059_v40 = vor.u32 %v4880_v31, %v4058_v30  ;;  %v3362_v21 = vld [vmem:[%s5391_s25 + $0x8] sm:$0xf]  ;;  %v4706_v24 = vld [vmem:[%s5391_s25 + $0x1c] sm:$0xf0] }
  0x86   : > { %2308 = vmatpush.bf16.msra.mxu3 %v4367_v37  ;;  %v4730_v37 = vld [vmem:[%s5391_s25 + $0xdc] sm:$0xf0] }
  0x87   : > { %2267 = vmatpush.bf16.msra.mxu0 %v3767_v44  ;;  %v4034_v44 = vld [vmem:[%s5391_s25 + $0x548] sm:$0xf]  ;;  %v3459_v46 = vor.u32 %v4730_v37, %v3458_v36  ;;  %v4802_v31 = vld [vmem:[%s5391_s25 + $0x31c] sm:$0xf0]  ;;  %v4940_v36 = vld [vmem:[%s5391_s25 + $0x76c] sm:$0xf0] }
  0x88   : > { %2281 = vmatpush.bf16.msra.mxu1 %v3959_v47  ;;  %v3651_v47 = vor.u32 %v4778_v41, %v3650_v38  ;;  %v4490_v37 = vld [vmem:[%s5391_s25 + $0x8d8] sm:$0xf]  ;;  %v3363_v38 = vor.u32 %v4706_v24, %v3362_v21  ;;  %v4745_v41 = vld [vmem:[%s5391_s25 + $0x15c] sm:$0xf]  ;;  %v3652_v21 = vld [vmem:[%s5391_s25 + $0x260] sm:$0xf0] }
  0x89   : > { %2295 = vmatpush.bf16.msra.mxu2 %v4151_v48  ;;  %v3843_v48 = vor.u32 %v4826_v43, %v3842_v42  ;;  %v3532_v42 = vld [vmem:[%s5391_s25 + $0x170] sm:$0xf0]  ;;  %v3555_v43 = vor.u32 %v4754_v28, %v3554_v27  ;;  %v4202_v27 = vld [vmem:[%s5391_s25 + $0x698] sm:$0xf]  ;;  %v4916_v28 = vld [vmem:[%s5391_s25 + $0x6ac] sm:$0xf0] }
  0x8a   : > { %2309 = vmatpush.bf16.msra.mxu3 %v4343_v52  ;;  %v4035_v52 = vor.u32 %v4874_v45, %v4034_v44  ;;  %v3747_v44 = vor.u32 %v4802_v31, %v3746_v29  ;;  %v4793_v45 = vld [vmem:[%s5391_s25 + $0x2dc] sm:$0xf]  ;;  %v3535_v50 = vor.u32 %v4745_v41, %v3532_v42  ;;  %v4394_v29 = vld [vmem:[%s5391_s25 + $0x818] sm:$0xf]  ;;  %v4964_v31 = vld [vmem:[%s5391_s25 + $0x82c] sm:$0xf0] }
  0x8b   : > { %2268 = vmatpush.bf16.msra.mxu0 %v3743_v60  ;;  %v3627_v60 = vor.u32 %v4772_v53, %v3626_v51  ;;  %v4274_v51 = vld [vmem:[%s5391_s25 + $0x728] sm:$0xf]  ;;  %v4910_v42 = vld [vmem:[%s5391_s25 + $0x67c] sm:$0xf0] }
  0x8c   : > { %2282 = vmatpush.bf16.msra.mxu1 %v3935_v0  ;;  %v3602_v0 = vld [vmem:[%s5391_s25 + $0x1e8] sm:$0xf] }
  0x8d   : > { %2296 = vmatpush.bf16.msra.mxu2 %v4127_v1  ;;  %v4011_v1 = vor.u32 %v4868_v58, %v4010_v56  ;;  %v3603_v9 = vor.u32 %v4766_v2, %v3602_v0  ;;  %v4466_v53 = vld [vmem:[%s5391_s25 + $0x8a8] sm:$0xf]  ;;  %v4739_v56 = vld [vmem:[%s5391_s25 + $0x12c] sm:$0xf]  ;;  %v3508_v58 = vld [vmem:[%s5391_s25 + $0x140] sm:$0xf0] }
  0x8e   : > { %2310 = vmatpush.bf16.msra.mxu3 %v4319_v4  ;;  %2269 = vmatmul.bf16.vlgmr.msra.gmra.mxu0 %v5532_v22  ;;  %v4814_v4 = vld [vmem:[%s5391_s25 + $0x37c] sm:$0xf0]  ;;  %v4250_v0 = vld [vmem:[%s5391_s25 + $0x6f8] sm:$0xf]  ;;  %v4178_v41 = vld [vmem:[%s5391_s25 + $0x668] sm:$0xf] }
  0x8f   : > { %2317 = vmatpush.bf16.msrb.mxu0 %v3531_v5  ;;  %2283 = vmatmul.bf16.vlgmr.msra.gmra.mxu1 %v5534_v23  ;;  %v3986_v5 = vld [vmem:[%s5391_s25 + $0x4e8] sm:$0xf]  ;;  %v3795_v10 = vor.u32 %v4814_v4, %v3794_v3  ;;  %v4442_v2 = vld [vmem:[%s5391_s25 + $0x878] sm:$0xf]  ;;  %v4976_v4 = vld [vmem:[%s5391_s25 + $0x88c] sm:$0xf0] }
  0x90   : > { %2331 = vmatpush.bf16.msrb.mxu1 %v3723_v7  ;;  %2297 = vmatmul.bf16.vlgmr.msra.gmra.mxu2 %v5593_v35  ;;  %v4862_v7 = vld [vmem:[%s5391_s25 + $0x4fc] sm:$0xf0] }
  0x91   : > { %2345 = vmatpush.bf16.msrb.mxu2 %v3915_v8  ;;  %2311 = vmatmul.bf16.vlgmr.msra.gmra.mxu3 %v5598_v39  ;;  %v3411_v8 = vor.u32 %v4718_v63, %v3410_v62  ;;  %v3987_v14 = vor.u32 %v4862_v7, %v3986_v5  ;;  %v4467_v62 = vor.u32 %v4982_v55, %v4466_v53  ;;  %v4733_v5 = vld [vmem:[%s5391_s25 + $0xfc] sm:$0xf]  ;;  %v3484_v7 = vld [vmem:[%s5391_s25 + $0x110] sm:$0xf0]  ;;  %v4154_v53 = vld [vmem:[%s5391_s25 + $0x638] sm:$0xf] }
  0x92   : > { %2359 = vmatpush.bf16.msrb.mxu3 %v4107_v12  ;;  %v4712_v12 = vld [vmem:[%s5391_s25 + $0x4c] sm:$0xf0]  ;;  %v3511_v63 = vor.u32 %v4739_v56, %v3508_v58  ;;  %v4346_v55 = vld [vmem:[%s5391_s25 + $0x7b8] sm:$0xf] }
  0x93   : > { %2318 = vmatpush.bf16.msrb.mxu0 %v3507_v18  ;;  %v3962_v18 = vld [vmem:[%s5391_s25 + $0x4b8] sm:$0xf]  ;;  %v4952_v58 = vld [vmem:[%s5391_s25 + $0x7cc] sm:$0xf0] }
  0x94   : > { %2332 = vmatpush.bf16.msrb.mxu1 %v3699_v19  ;;  %v4856_v19 = vld [vmem:[%s5391_s25 + $0x4cc] sm:$0xf0] }
  0x95   : > { %2346 = vmatpush.bf16.msrb.mxu2 %v3891_v20  ;;  %v3387_v20 = vor.u32 %v4712_v12, %v3386_v11  ;;  %v3963_v30 = vor.u32 %v4856_v19, %v3962_v18  ;;  %v4443_v11 = vor.u32 %v4976_v4, %v4442_v2  ;;  %v3487_v12 = vor.u32 %v4733_v5, %v3484_v7  ;;  %v4727_v18 = vld [vmem:[%s5391_s25 + $0xcc] sm:$0xf]  ;;  %v3460_v19 = vld [vmem:[%s5391_s25 + $0xe0] sm:$0xf0]  ;;  %v4322_v4 = vld [vmem:[%s5391_s25 + $0x788] sm:$0xf] }
  0x96   : > { %2360 = vmatpush.bf16.msrb.mxu3 %v4083_v26  ;;  %v3771_v26 = vor.u32 %v4808_v17, %v3770_v16  ;;  %v4970_v17 = vld [vmem:[%s5391_s25 + $0x85c] sm:$0xf0]  ;;  %v4347_v2 = vor.u32 %v4952_v58, %v4346_v55  ;;  %v4703_v7 = vld [vmem:[%s5391_s25 + $0xc] sm:$0xf] }
  0x97   : > { %2319 = vmatpush.bf16.msrb.mxu0 %v3483_v32  ;;  %v3938_v32 = vld [vmem:[%s5391_s25 + $0x488] sm:$0xf]  ;;  %v4946_v5 = vld [vmem:[%s5391_s25 + $0x79c] sm:$0xf0]  ;;  %v4823_v55 = vld [vmem:[%s5391_s25 + $0x3cc] sm:$0xf] }
  0x98   : > { %2333 = vmatpush.bf16.msrb.mxu1 %v3675_v33  ;;  %v4850_v33 = vld [vmem:[%s5391_s25 + $0x49c] sm:$0xf0]  ;;  %v4871_v58 = vld [vmem:[%s5391_s25 + $0x54c] sm:$0xf] }
  0x99   : > { %2347 = vmatpush.bf16.msrb.mxu2 %v3867_v34  ;;  %v4298_v34 = vld [vmem:[%s5391_s25 + $0x758] sm:$0xf] }
  0x9a   : > { %2361 = vmatpush.bf16.msrb.mxu3 %v4059_v40  ;;  %v4988_v40 = vld [vmem:[%s5391_s25 + $0x8ec] sm:$0xf0] }
  0x9b   : > { %2320 = vmatpush.bf16.msrb.mxu0 %v3459_v46  ;;  %v3724_v46 = vld [vmem:[%s5391_s25 + $0x2f0] sm:$0xf0]  ;;  %v4491_v49 = vor.u32 %v4988_v40, %v4490_v37  ;;  %v4203_v37 = vor.u32 %v4916_v28, %v4202_v27 }
  0x9c   : > { %2334 = vmatpush.bf16.msrb.mxu1 %v3651_v47  ;;  %v3939_v47 = vor.u32 %v4850_v33, %v3938_v32  ;;  %v3727_v54 = vor.u32 %v4793_v45, %v3724_v46  ;;  %v4721_v32 = vld [vmem:[%s5391_s25 + $0x9c] sm:$0xf]  ;;  %v3436_v33 = vld [vmem:[%s5391_s25 + $0xb0] sm:$0xf0]  ;;  %v4958_v45 = vld [vmem:[%s5391_s25 + $0x7fc] sm:$0xf0] }
  0x9d   : > { %2348 = vmatpush.bf16.msrb.mxu2 %v3843_v48  ;;  %v4299_v48 = vor.u32 %v4940_v36, %v4298_v34  ;;  %v4769_v34 = vld [vmem:[%s5391_s25 + $0x21c] sm:$0xf]  ;;  %v3628_v36 = vld [vmem:[%s5391_s25 + $0x230] sm:$0xf0]  ;;  %v3439_v40 = vor.u32 %v4721_v32, %v3436_v33  ;;  %v4715_v46 = vld [vmem:[%s5391_s25 + $0x6c] sm:$0xf] }
  0x9e   : > { %2362 = vmatpush.bf16.msrb.mxu3 %v4035_v52  ;;  %v4934_v52 = vld [vmem:[%s5391_s25 + $0x73c] sm:$0xf0]  ;;  %v4084_v33 = vld [vmem:[%s5391_s25 + $0x5c0] sm:$0xf0] }
  0x9f   : > { %2321 = vmatpush.bf16.msrb.mxu0 %v3435_v59  ;;  %v4787_v59 = vld [vmem:[%s5391_s25 + $0x2ac] sm:$0xf] }
  0xa0   : > { %2335 = vmatpush.bf16.msrb.mxu1 %v3627_v60  ;;  %v3700_v60 = vld [vmem:[%s5391_s25 + $0x2c0] sm:$0xf0] }
  0xa1   : > { %2349 = vmatpush.bf16.msrb.mxu2 %v3819_v61  ;;  %v4275_v61 = vor.u32 %v4934_v52, %v4274_v51  ;;  %v3703_v3 = vor.u32 %v4787_v59, %v3700_v60  ;;  %v4709_v59 = vld [vmem:[%s5391_s25 + $0x3c] sm:$0xf]  ;;  %v3388_v60 = vld [vmem:[%s5391_s25 + $0x50] sm:$0xf0] }
  0xa2   : > { %2363 = vmatpush.bf16.msrb.mxu3 %v4011_v1  ;;  %v4928_v1 = vld [vmem:[%s5391_s25 + $0x70c] sm:$0xf0] }
  0xa3   : > { %2322 = vmatpush.bf16.msrb.mxu0 %v3411_v8  ;;  %v4781_v8 = vld [vmem:[%s5391_s25 + $0x27c] sm:$0xf] }
  0xa4   : > { %2336 = vmatpush.bf16.msrb.mxu1 %v3603_v9  ;;  %v3676_v9 = vld [vmem:[%s5391_s25 + $0x290] sm:$0xf0] }
  0xa5   : > { %2350 = vmatpush.bf16.msrb.mxu2 %v3795_v10  ;;  %v4251_v10 = vor.u32 %v4928_v1, %v4250_v0  ;;  %v3679_v16 = vor.u32 %v4781_v8, %v3676_v9  ;;  %v4130_v0 = vld [vmem:[%s5391_s25 + $0x608] sm:$0xf]  ;;  %v4898_v1 = vld [vmem:[%s5391_s25 + $0x61c] sm:$0xf0]  ;;  %v3364_v9 = vld [vmem:[%s5391_s25 + $0x20] sm:$0xf0] }
  0xa6   : > { %2364 = vmatpush.bf16.msrb.mxu3 %v3987_v14  ;;  %v4922_v14 = vld [vmem:[%s5391_s25 + $0x6dc] sm:$0xf0] }
  0xa7   : > { %2323 = vmatpush.bf16.msrb.mxu0 %v3387_v20  ;;  %v4775_v20 = vld [vmem:[%s5391_s25 + $0x24c] sm:$0xf]  ;;  %v4227_v24 = vor.u32 %v4922_v14, %v4226_v13  ;;  %v3916_v13 = vld [vmem:[%s5391_s25 + $0x470] sm:$0xf0]  ;;  %v4889_v14 = vld [vmem:[%s5391_s25 + $0x5dc] sm:$0xf] }
  0xa8   : > { %2337 = vmatpush.bf16.msrb.mxu1 %v3579_v25  ;;  %v4419_v25 = vor.u32 %v4970_v17, %v4418_v15  ;;  %v4131_v15 = vor.u32 %v4898_v1, %v4130_v0  ;;  %v4937_v17 = vld [vmem:[%s5391_s25 + $0x75c] sm:$0xf]  ;;  %v4420_v0 = vld [vmem:[%s5391_s25 + $0x860] sm:$0xf0] }
  0xa9   : > { %2351 = vmatpush.bf16.msrb.mxu2 %v3771_v26  ;;  %v3463_v26 = vor.u32 %v4727_v18, %v3460_v19  ;;  %v4300_v18 = vld [vmem:[%s5391_s25 + $0x770] sm:$0xf0]  ;;  %v4323_v19 = vor.u32 %v4946_v5, %v4322_v4  ;;  %v4817_v4 = vld [vmem:[%s5391_s25 + $0x39c] sm:$0xf] }
  0xaa   : > { %2365 = vmatpush.bf16.msrb.mxu3 %v3963_v30  ;;  %v3655_v30 = vor.u32 %v4775_v20, %v3652_v21  ;;  %v3367_v20 = vor.u32 %v4703_v7, %v3364_v9  ;;  %v4985_v21 = vld [vmem:[%s5391_s25 + $0x8dc] sm:$0xf]  ;;  %v4303_v28 = vor.u32 %v4937_v17, %v4300_v18  ;;  %v3820_v5 = vld [vmem:[%s5391_s25 + $0x3b0] sm:$0xf0]  ;;  %v4811_v17 = vld [vmem:[%s5391_s25 + $0x36c] sm:$0xf] }
  0xab   : > { %2324 = vmatpush.bf16.msrb.mxu0 %v3363_v38  ;;  %v4395_v38 = vor.u32 %v4964_v31, %v4394_v29  ;;  %v4835_v29 = vld [vmem:[%s5391_s25 + $0x42c] sm:$0xf]  ;;  %v4865_v7 = vld [vmem:[%s5391_s25 + $0x51c] sm:$0xf]  ;;  %v4012_v9 = vld [vmem:[%s5391_s25 + $0x530] sm:$0xf0] }
  0xac   : > { %2338 = vmatpush.bf16.msrb.mxu1 %v3555_v43  ;;  %v4370_v43 = vld [vmem:[%s5391_s25 + $0x7e8] sm:$0xf]  ;;  %v4883_v31 = vld [vmem:[%s5391_s25 + $0x5ac] sm:$0xf]  ;;  %v3796_v18 = vld [vmem:[%s5391_s25 + $0x380] sm:$0xf0] }
  0xad   : > { %2352 = vmatpush.bf16.msrb.mxu2 %v3747_v44  ;;  %v3631_v44 = vor.u32 %v4769_v34, %v3628_v36  ;;  %v4371_v51 = vor.u32 %v4958_v45, %v4370_v43  ;;  %v4931_v34 = vld [vmem:[%s5391_s25 + $0x72c] sm:$0xf]  ;;  %v4276_v36 = vld [vmem:[%s5391_s25 + $0x740] sm:$0xf0]  ;;  %v4829_v43 = vld [vmem:[%s5391_s25 + $0x3fc] sm:$0xf] }
  0xae   : > { %2366 = vmatpush.bf16.msrb.mxu3 %v3939_v47  ;;  %2325 = vmatmul.bf16.vlgmr.msrb.gmra.mxu0 %v5494_v57  ;;  %v3412_v47 = vld [vmem:[%s5391_s25 + $0x80] sm:$0xf0]  ;;  %v4877_v45 = vld [vmem:[%s5391_s25 + $0x57c] sm:$0xf] }
  0xaf   : > { %2373 = vmatpush.bf16.msra.mxu0 %v4299_v48  ;;  %2339 = vmatmul.bf16.vlgmr.msrb.gmra.mxu1 %v5510_v6  ;;  %v4763_v48 = vld [vmem:[%s5391_s25 + $0x1ec] sm:$0xf]  ;;  %v3415_v52 = vor.u32 %v4715_v46, %v3412_v47  ;;  %v4060_v47 = vld [vmem:[%s5391_s25 + $0x590] sm:$0xf0] }
  0xb0   : > { %2387 = vmatpush.bf16.msra.mxu1 %v4491_v49  ;;  %2353 = vmatmul.bf16.vlgmr.msrb.gmra.mxu2 %v5532_v22  ;;  %v3604_v49 = vld [vmem:[%s5391_s25 + $0x200] sm:$0xf0] }
  0xb1   : > { %2401 = vmatpush.bf16.msra.mxu2 %v3535_v50  ;;  %2367 = vmatmul.bf16.vlgmr.msrb.gmra.mxu3 %v5534_v23  ;;  %v4179_v50 = vor.u32 %v4910_v42, %v4178_v41  ;;  %v3607_v56 = vor.u32 %v4763_v48, %v3604_v49  ;;  %v4087_v41 = vor.u32 %v4883_v31, %v4084_v33  ;;  %v4925_v48 = vld [vmem:[%s5391_s25 + $0x6fc] sm:$0xf]  ;;  %v4252_v49 = vld [vmem:[%s5391_s25 + $0x710] sm:$0xf0] }
  0xb2   : > { %2415 = vmatpush.bf16.msra.mxu3 %v3727_v54  ;;  %v4904_v54 = vld [vmem:[%s5391_s25 + $0x64c] sm:$0xf0]  ;;  %v4279_v42 = vor.u32 %v4931_v34, %v4276_v36  ;;  %v4805_v31 = vld [vmem:[%s5391_s25 + $0x33c] sm:$0xf]  ;;  %v3964_v36 = vld [vmem:[%s5391_s25 + $0x4d0] sm:$0xf0] }
  0xb3   : > { %2374 = vmatpush.bf16.msra.mxu0 %v4275_v61  ;;  %v4757_v61 = vld [vmem:[%s5391_s25 + $0x1bc] sm:$0xf] }
  0xb4   : > { %2388 = vmatpush.bf16.msra.mxu1 %v4467_v62  ;;  %v3580_v62 = vld [vmem:[%s5391_s25 + $0x1d0] sm:$0xf0]  ;;  %v4853_v33 = vld [vmem:[%s5391_s25 + $0x4bc] sm:$0xf] }
  0xb5   : > { %2402 = vmatpush.bf16.msra.mxu2 %v3511_v63  ;;  %v4155_v63 = vor.u32 %v4904_v54, %v4154_v53  ;;  %v3583_v8 = vor.u32 %v4757_v61, %v3580_v62  ;;  %v4063_v53 = vor.u32 %v4877_v45, %v4060_v47  ;;  %v4255_v54 = vor.u32 %v4925_v48, %v4252_v49  ;;  %v4919_v61 = vld [vmem:[%s5391_s25 + $0x6cc] sm:$0xf]  ;;  %v4228_v62 = vld [vmem:[%s5391_s25 + $0x6e0] sm:$0xf0] }
  0xb6   : > { %2416 = vmatpush.bf16.msra.mxu3 %v3703_v3  ;;  %v3391_v3 = vor.u32 %v4709_v59, %v3388_v60  ;;  %v4036_v60 = vld [vmem:[%s5391_s25 + $0x560] sm:$0xf0]  ;;  %v3967_v45 = vor.u32 %v4853_v33, %v3964_v36  ;;  %v4847_v47 = vld [vmem:[%s5391_s25 + $0x48c] sm:$0xf]  ;;  %v3466_v33 = vld [vmem:[%s5391_s25 + $0xd0] sm:$0xf] }
  0xb7   : > { %2375 = vmatpush.bf16.msra.mxu0 %v4251_v10  ;;  %v4751_v10 = vld [vmem:[%s5391_s25 + $0x18c] sm:$0xf]  ;;  %v3940_v48 = vld [vmem:[%s5391_s25 + $0x4a0] sm:$0xf0]  ;;  %v3658_v36 = vld [vmem:[%s5391_s25 + $0x250] sm:$0xf] }
  0xb8   : > { %2389 = vmatpush.bf16.msra.mxu1 %v4443_v11  ;;  %v3556_v11 = vld [vmem:[%s5391_s25 + $0x1a0] sm:$0xf0]  ;;  %v4895_v49 = vld [vmem:[%s5391_s25 + $0x60c] sm:$0xf] }
  0xb9   : > { %2403 = vmatpush.bf16.msra.mxu2 %v3487_v12  ;;  %v4841_v12 = vld [vmem:[%s5391_s25 + $0x45c] sm:$0xf] }
  0xba   : > { %2417 = vmatpush.bf16.msra.mxu3 %v3679_v16  ;;  %v4108_v16 = vld [vmem:[%s5391_s25 + $0x5f0] sm:$0xf0] }
  0xbb   : > { %2376 = vmatpush.bf16.msra.mxu0 %v4227_v24  ;;  %v4492_v24 = vld [vmem:[%s5391_s25 + $0x8f0] sm:$0xf0]  ;;  %v4111_v27 = vor.u32 %v4889_v14, %v4108_v16  ;;  %v3823_v14 = vor.u32 %v4817_v4, %v3820_v5 }
  0xbc   : > { %2390 = vmatpush.bf16.msra.mxu1 %v4419_v25  ;;  %v3559_v25 = vor.u32 %v4751_v10, %v3556_v11  ;;  %v4495_v32 = vor.u32 %v4985_v21, %v4492_v24  ;;  %v4913_v10 = vld [vmem:[%s5391_s25 + $0x69c] sm:$0xf]  ;;  %v4204_v11 = vld [vmem:[%s5391_s25 + $0x6b0] sm:$0xf0]  ;;  %v3988_v21 = vld [vmem:[%s5391_s25 + $0x500] sm:$0xf0] }
  0xbd   : > { %2404 = vmatpush.bf16.msra.mxu2 %v3463_v26  ;;  %v3919_v26 = vor.u32 %v4841_v12, %v3916_v13  ;;  %v4961_v12 = vld [vmem:[%s5391_s25 + $0x81c] sm:$0xf]  ;;  %v4396_v13 = vld [vmem:[%s5391_s25 + $0x830] sm:$0xf0]  ;;  %v4207_v16 = vor.u32 %v4913_v10, %v4204_v11  ;;  %v4907_v24 = vld [vmem:[%s5391_s25 + $0x66c] sm:$0xf] }
  0xbe   : > { %2418 = vmatpush.bf16.msra.mxu3 %v3655_v30  ;;  %v3892_v30 = vld [vmem:[%s5391_s25 + $0x440] sm:$0xf0]  ;;  %v4791_v11 = vld [vmem:[%s5391_s25 + $0x2c4] sm:$0xf0] }
  0xbf   : > { %2377 = vmatpush.bf16.msra.mxu0 %v4203_v37  ;;  %v4979_v37 = vld [vmem:[%s5391_s25 + $0x8ac] sm:$0xf] }
  0xc0   : > { %2391 = vmatpush.bf16.msra.mxu1 %v4395_v38  ;;  %v4468_v38 = vld [vmem:[%s5391_s25 + $0x8c0] sm:$0xf0] }
  0xc1   : > { %2405 = vmatpush.bf16.msra.mxu2 %v3439_v40  ;;  %v3895_v40 = vor.u32 %v4835_v29, %v3892_v30  ;;  %v4471_v46 = vor.u32 %v4979_v37, %v4468_v38  ;;  %v4901_v37 = vld [vmem:[%s5391_s25 + $0x63c] sm:$0xf]  ;;  %v4156_v38 = vld [vmem:[%s5391_s25 + $0x650] sm:$0xf0] }
  0xc2   : > { %2419 = vmatpush.bf16.msra.mxu3 %v3631_v44  ;;  %v3868_v44 = vld [vmem:[%s5391_s25 + $0x410] sm:$0xf0] }
  0xc3   : > { %2378 = vmatpush.bf16.msra.mxu0 %v4179_v50  ;;  %v4973_v50 = vld [vmem:[%s5391_s25 + $0x87c] sm:$0xf] }
  0xc4   : > { %2392 = vmatpush.bf16.msra.mxu1 %v4371_v51  ;;  %v4444_v51 = vld [vmem:[%s5391_s25 + $0x890] sm:$0xf0] }
  0xc5   : > { %2406 = vmatpush.bf16.msra.mxu2 %v3415_v52  ;;  %v3871_v52 = vor.u32 %v4829_v43, %v3868_v44  ;;  %v4447_v59 = vor.u32 %v4973_v50, %v4444_v51  ;;  %v4799_v43 = vld [vmem:[%s5391_s25 + $0x30c] sm:$0xf]  ;;  %v3748_v44 = vld [vmem:[%s5391_s25 + $0x320] sm:$0xf0] }
  0xc6   : > { %2420 = vmatpush.bf16.msra.mxu3 %v3607_v56  ;;  %v3844_v56 = vld [vmem:[%s5391_s25 + $0x3e0] sm:$0xf0] }
  0xc7   : > { %2379 = vmatpush.bf16.msra.mxu0 %v4155_v63  ;;  %v4967_v63 = vld [vmem:[%s5391_s25 + $0x84c] sm:$0xf]  ;;  %v3847_v1 = vor.u32 %v4823_v55, %v3844_v56  ;;  %v4132_v51 = vld [vmem:[%s5391_s25 + $0x620] sm:$0xf0]  ;;  %v4749_v55 = vld [vmem:[%s5391_s25 + $0x174] sm:$0xf0] }
  0xc8   : > { %2393 = vmatpush.bf16.msra.mxu1 %v4347_v2  ;;  %v4039_v2 = vor.u32 %v4871_v58, %v4036_v60  ;;  %v3730_v56 = vld [vmem:[%s5391_s25 + $0x2e0] sm:$0xf]  ;;  %v3751_v58 = vor.u32 %v4799_v43, %v3748_v44  ;;  %v4875_v43 = vld [vmem:[%s5391_s25 + $0x564] sm:$0xf0] }
  0xc9   : > { %2407 = vmatpush.bf16.msra.mxu2 %v3391_v3  ;;  %v4231_v3 = vor.u32 %v4919_v61, %v4228_v62  ;;  %v3922_v60 = vld [vmem:[%s5391_s25 + $0x460] sm:$0xf]  ;;  %v4845_v61 = vld [vmem:[%s5391_s25 + $0x474] sm:$0xf0]  ;;  %v3943_v62 = vor.u32 %v4847_v47, %v3940_v48 }
  0xca   : > { %2421 = vmatpush.bf16.msra.mxu3 %v3583_v8  ;;  %v4423_v8 = vor.u32 %v4967_v63, %v4420_v0  ;;  %v4135_v63 = vor.u32 %v4895_v49, %v4132_v51  ;;  %v4114_v0 = vld [vmem:[%s5391_s25 + $0x5e0] sm:$0xf]  ;;  %v3923_v5 = vor.u32 %v4845_v61, %v3922_v60  ;;  %v4725_v48 = vld [vmem:[%s5391_s25 + $0xb4] sm:$0xf0]  ;;  %v3418_v60 = vld [vmem:[%s5391_s25 + $0x70] sm:$0xf] }
  0xcb   : > { %2380 = vmatpush.bf16.msra.mxu0 %v4131_v15  ;;  %v4015_v15 = vor.u32 %v4865_v7, %v4012_v9  ;;  %v3514_v7 = vld [vmem:[%s5391_s25 + $0x130] sm:$0xf]  ;;  %v3442_v47 = vld [vmem:[%s5391_s25 + $0xa0] sm:$0xf]  ;;  %v4773_v51 = vld [vmem:[%s5391_s25 + $0x234] sm:$0xf0] }
  0xcc   : > { %2394 = vmatpush.bf16.msra.mxu1 %v4323_v19  ;;  %v4859_v19 = vld [vmem:[%s5391_s25 + $0x4ec] sm:$0xf]  ;;  %v3706_v9 = vld [vmem:[%s5391_s25 + $0x2b0] sm:$0xf]  ;;  %v3634_v49 = vld [vmem:[%s5391_s25 + $0x220] sm:$0xf] }
  0xcd   : > { %2408 = vmatpush.bf16.msra.mxu2 %v3367_v20  ;;  %v4399_v20 = vor.u32 %v4961_v12, %v4396_v13  ;;  %v3991_v29 = vor.u32 %v4859_v19, %v3988_v21  ;;  %v3898_v12 = vld [vmem:[%s5391_s25 + $0x430] sm:$0xf]  ;;  %v4839_v13 = vld [vmem:[%s5391_s25 + $0x444] sm:$0xf0]  ;;  %v3490_v19 = vld [vmem:[%s5391_s25 + $0x100] sm:$0xf] }
  0xce   : > { %2422 = vmatpush.bf16.msra.mxu3 %v3559_v25  ;;  %2381 = vmatmul.bf16.vlgmr.msra.gmra.mxu0 %v5593_v35  ;;  %v4180_v25 = vld [vmem:[%s5391_s25 + $0x680] sm:$0xf0]  ;;  %v3682_v21 = vld [vmem:[%s5391_s25 + $0x280] sm:$0xf]  ;;  %v4719_v61 = vld [vmem:[%s5391_s25 + $0x84] sm:$0xf0] }
  0xcf   : > { %2429 = vmatpush.bf16.msrb.mxu0 %v3919_v26  ;;  %2395 = vmatmul.bf16.vlgmr.msra.gmra.mxu1 %v5598_v39  ;;  %v4955_v26 = vld [vmem:[%s5391_s25 + $0x7ec] sm:$0xf]  ;;  %v4183_v30 = vor.u32 %v4907_v24, %v4180_v25  ;;  %v4785_v25 = vld [vmem:[%s5391_s25 + $0x294] sm:$0xf0] }
  0xd0   : > { %2443 = vmatpush.bf16.msrb.mxu1 %v4111_v27  ;;  %2409 = vmatmul.bf16.vlgmr.msra.gmra.mxu2 %v5494_v57  ;;  %v4372_v27 = vld [vmem:[%s5391_s25 + $0x800] sm:$0xf0] }
  0xd1   : > { %2457 = vmatpush.bf16.msrb.mxu2 %v4303_v28  ;;  %2423 = vmatmul.bf16.vlgmr.msra.gmra.mxu3 %v5510_v6  ;;  %v3799_v28 = vor.u32 %v4811_v17, %v3796_v18  ;;  %v4375_v34 = vor.u32 %v4955_v26, %v4372_v27  ;;  %v3707_v17 = vor.u32 %v4791_v11, %v3706_v9  ;;  %v3874_v26 = vld [vmem:[%s5391_s25 + $0x400] sm:$0xf]  ;;  %v4833_v27 = vld [vmem:[%s5391_s25 + $0x414] sm:$0xf0] }
  0xd2   : > { %2471 = vmatpush.bf16.msrb.mxu3 %v4495_v32  ;;  %v3772_v32 = vld [vmem:[%s5391_s25 + $0x350] sm:$0xf0]  ;;  %v3899_v18 = vor.u32 %v4839_v13, %v3898_v12  ;;  %v3394_v9 = vld [vmem:[%s5391_s25 + $0x40] sm:$0xf]  ;;  %v4761_v13 = vld [vmem:[%s5391_s25 + $0x1d4] sm:$0xf0] }
  0xd3   : > { %2430 = vmatpush.bf16.msrb.mxu0 %v3895_v40  ;;  %v4949_v40 = vld [vmem:[%s5391_s25 + $0x7bc] sm:$0xf]  ;;  %v3586_v11 = vld [vmem:[%s5391_s25 + $0x1c0] sm:$0xf] }
  0xd4   : > { %2444 = vmatpush.bf16.msrb.mxu1 %v4087_v41  ;;  %v4348_v41 = vld [vmem:[%s5391_s25 + $0x7d0] sm:$0xf0] }
  0xd5   : > { %2458 = vmatpush.bf16.msrb.mxu2 %v4279_v42  ;;  %v3775_v42 = vor.u32 %v4805_v31, %v3772_v32  ;;  %v4351_v50 = vor.u32 %v4949_v40, %v4348_v41  ;;  %v3683_v31 = vor.u32 %v4785_v25, %v3682_v21  ;;  %v3875_v32 = vor.u32 %v4833_v27, %v3874_v26  ;;  %v3850_v40 = vld [vmem:[%s5391_s25 + $0x3d0] sm:$0xf]  ;;  %v4827_v41 = vld [vmem:[%s5391_s25 + $0x3e4] sm:$0xf0]  ;;  %v5920_v21 = vpop.f32.mrf.mxu0 }
  0xd6   : > { %2472 = vmatpush.bf16.msrb.mxu3 %v4471_v46  ;;  %v4159_v46 = vor.u32 %v4901_v37, %v4156_v38  ;;  %v4779_v38 = vld [vmem:[%s5391_s25 + $0x264] sm:$0xf0]  ;;  %v3562_v26 = vld [vmem:[%s5391_s25 + $0x190] sm:$0xf] }
  0xd7   : > { %2431 = vmatpush.bf16.msrb.mxu0 %v3871_v52  ;;  %v4943_v52 = vld [vmem:[%s5391_s25 + $0x78c] sm:$0xf]  ;;  %v4755_v27 = vld [vmem:[%s5391_s25 + $0x1a4] sm:$0xf0] }
  0xd8   : > { %2445 = vmatpush.bf16.msrb.mxu1 %v4063_v53  ;;  %v4324_v53 = vld [vmem:[%s5391_s25 + $0x7a0] sm:$0xf0] }
  0xd9   : > { %2459 = vmatpush.bf16.msrb.mxu2 %v4255_v54  ;;  %v3538_v54 = vld [vmem:[%s5391_s25 + $0x160] sm:$0xf] }
  0xda   : > { %2473 = vmatpush.bf16.msrb.mxu3 %v4447_v59  ;;  %v4797_v59 = vld [vmem:[%s5391_s25 + $0x2f4] sm:$0xf0] }
  0xdb   : > { %2432 = vmatpush.bf16.msrb.mxu0 %v3847_v1  ;;  %v4893_v1 = vld [vmem:[%s5391_s25 + $0x5f4] sm:$0xf0]  ;;  %v3731_v4 = vor.u32 %v4797_v59, %v3730_v56  ;;  %v3443_v56 = vor.u32 %v4725_v48, %v3442_v47 }
  0xdc   : > { %2446 = vmatpush.bf16.msrb.mxu1 %v4039_v2  ;;  %v4327_v2 = vor.u32 %v4943_v52, %v4324_v53  ;;  %v4115_v10 = vor.u32 %v4893_v1, %v4114_v0  ;;  %v3826_v52 = vld [vmem:[%s5391_s25 + $0x3a0] sm:$0xf]  ;;  %v4821_v53 = vld [vmem:[%s5391_s25 + $0x3b4] sm:$0xf0]  ;;  %v4767_v0 = vld [vmem:[%s5391_s25 + $0x204] sm:$0xf0] }
  0xdd   : > { %2460 = vmatpush.bf16.msrb.mxu2 %v4231_v3  ;;  %v3539_v3 = vor.u32 %v4749_v55, %v3538_v54  ;;  %v4018_v54 = vld [vmem:[%s5391_s25 + $0x520] sm:$0xf]  ;;  %v4869_v55 = vld [vmem:[%s5391_s25 + $0x534] sm:$0xf0]  ;;  %v3827_v59 = vor.u32 %v4821_v53, %v3826_v52  ;;  %v3802_v1 = vld [vmem:[%s5391_s25 + $0x370] sm:$0xf] }
  0xde   : > { %2474 = vmatpush.bf16.msrb.mxu3 %v4423_v8  ;;  %v4743_v8 = vld [vmem:[%s5391_s25 + $0x144] sm:$0xf0]  ;;  %v4474_v53 = vld [vmem:[%s5391_s25 + $0x8b0] sm:$0xf] }
  0xdf   : > { %2433 = vmatpush.bf16.msrb.mxu0 %v3823_v14  ;;  %v4090_v14 = vld [vmem:[%s5391_s25 + $0x5b0] sm:$0xf]  ;;  %v4935_v52 = vld [vmem:[%s5391_s25 + $0x744] sm:$0xf0] }
  0xe0   : > { %2447 = vmatpush.bf16.msrb.mxu1 %v4015_v15  ;;  %v4887_v15 = vld [vmem:[%s5391_s25 + $0x5c4] sm:$0xf0] }
  0xe1   : > { %2461 = vmatpush.bf16.msrb.mxu2 %v4207_v16  ;;  %v3515_v16 = vor.u32 %v4743_v8, %v3514_v7  ;;  %v4091_v24 = vor.u32 %v4887_v15, %v4090_v14  ;;  %v3778_v14 = vld [vmem:[%s5391_s25 + $0x340] sm:$0xf]  ;;  %v4809_v15 = vld [vmem:[%s5391_s25 + $0x354] sm:$0xf0] }
  0xe2   : > { %2475 = vmatpush.bf16.msrb.mxu3 %v4399_v20  ;;  %v4737_v20 = vld [vmem:[%s5391_s25 + $0x114] sm:$0xf0]  ;;  %v3779_v25 = vor.u32 %v4809_v15, %v3778_v14  ;;  %v5964_v14 = vpop.f32.mrf.mxu3 }
  0xe3   : > { %2434 = vmatpush.bf16.msrb.mxu0 %v3799_v28  ;;  %v4066_v28 = vld [vmem:[%s5391_s25 + $0x580] sm:$0xf] }
  0xe4   : > { %2448 = vmatpush.bf16.msrb.mxu1 %v3991_v29  ;;  %v4881_v29 = vld [vmem:[%s5391_s25 + $0x594] sm:$0xf0] }
  0xe5   : > { %2462 = vmatpush.bf16.msrb.mxu2 %v4183_v30  ;;  %v3491_v30 = vor.u32 %v4737_v20, %v3490_v19  ;;  %v4067_v37 = vor.u32 %v4881_v29, %v4066_v28  ;;  %v3370_v19 = vld [vmem:[%s5391_s25 + $0x10] sm:$0xf]  ;;  %v4707_v20 = vld [vmem:[%s5391_s25 + $0x24] sm:$0xf0] }
  0xe6   : > { %2476 = vmatpush.bf16.msrb.mxu3 %v4375_v34  ;;  %v4731_v34 = vld [vmem:[%s5391_s25 + $0xe4] sm:$0xf0]  ;;  %v3754_v28 = vld [vmem:[%s5391_s25 + $0x310] sm:$0xf] }
  0xe7   : > { %2435 = vmatpush.bf16.msrb.mxu0 %v3775_v42  ;;  %v4042_v42 = vld [vmem:[%s5391_s25 + $0x550] sm:$0xf]  ;;  %v3467_v44 = vor.u32 %v4731_v34, %v3466_v33  ;;  %v5928_v33 = vpop.f32.mrf.mxu1  ;;  %v4306_v34 = vld [vmem:[%s5391_s25 + $0x760] sm:$0xf] }
  0xe8   : > { %2449 = vmatpush.bf16.msrb.mxu1 %v3967_v45  ;;  %v3659_v45 = vor.u32 %v4779_v38, %v3658_v36  ;;  %v4941_v36 = vld [vmem:[%s5391_s25 + $0x774] sm:$0xf0]  ;;  %v3371_v38 = vor.u32 %v4707_v20, %v3370_v19  ;;  %v4426_v19 = vld [vmem:[%s5391_s25 + $0x850] sm:$0xf] }
  0xe9   : > { %2463 = vmatpush.bf16.msrb.mxu2 %v4159_v46  ;;  %v3851_v46 = vor.u32 %v4827_v41, %v3850_v40  ;;  %v4989_v40 = vld [vmem:[%s5391_s25 + $0x8f4] sm:$0xf0]  ;;  %v4746_v41 = vld [vmem:[%s5391_s25 + $0x164] sm:$0xf]  ;;  %v4307_v48 = vor.u32 %v4941_v36, %v4306_v34  ;;  %v4402_v36 = vld [vmem:[%s5391_s25 + $0x820] sm:$0xf] }
  0xea   : > { %2477 = vmatpush.bf16.msrb.mxu3 %v4351_v50  ;;  %v4043_v50 = vor.u32 %v4875_v43, %v4042_v42  ;;  %v3540_v42 = vld [vmem:[%s5391_s25 + $0x178] sm:$0xf0]  ;;  %v3563_v43 = vor.u32 %v4755_v27, %v3562_v26  ;;  %v3468_v26 = vld [vmem:[%s5391_s25 + $0xe8] sm:$0xf0]  ;;  %v4776_v27 = vld [vmem:[%s5391_s25 + $0x254] sm:$0xf] }
  0xeb   : > { %2436 = vmatpush.bf16.msrb.mxu0 %v3751_v58  ;;  %v3635_v58 = vor.u32 %v4773_v51, %v3634_v49  ;;  %v4282_v51 = vld [vmem:[%s5391_s25 + $0x730] sm:$0xf]  ;;  %v4917_v34 = vld [vmem:[%s5391_s25 + $0x6b4] sm:$0xf0] }
  0xec   : > { %2450 = vmatpush.bf16.msrb.mxu1 %v3943_v62  ;;  %v3610_v62 = vld [vmem:[%s5391_s25 + $0x1f0] sm:$0xf] }
  0xed   : > { %2464 = vmatpush.bf16.msrb.mxu2 %v4135_v63  ;;  %v4019_v63 = vor.u32 %v4869_v55, %v4018_v54  ;;  %v3611_v7 = vor.u32 %v4767_v0, %v3610_v62  ;;  %v4983_v55 = vld [vmem:[%s5391_s25 + $0x8c4] sm:$0xf0]  ;;  %v5946_v62 = vpop.f32.mrf.mxu0 }
  0xee   : > { %2478 = vmatpush.bf16.msrb.mxu3 %v4327_v2  ;;  %2437 = vmatmul.bf16.vlgmr.msrb.gmra.mxu0 %v5532_v22  ;;  %v4815_v2 = vld [vmem:[%s5391_s25 + $0x384] sm:$0xf0]  ;;  %v4475_v0 = vor.u32 %v4983_v55, %v4474_v53  ;;  %v4716_v55 = vld [vmem:[%s5391_s25 + $0x74] sm:$0xf] }
  0xef   : > { %2485 = vmatpush.bf16.msra.mxu0 %v3539_v3  ;;  %2451 = vmatmul.bf16.vlgmr.msrb.gmra.mxu1 %v5534_v23  ;;  %v3994_v3 = vld [vmem:[%s5391_s25 + $0x4f0] sm:$0xf]  ;;  %v3803_v8 = vor.u32 %v4815_v2, %v3802_v1  ;;  %v4258_v2 = vld [vmem:[%s5391_s25 + $0x700] sm:$0xf] }
  0xf0   : > { %2499 = vmatpush.bf16.msra.mxu1 %v3731_v4  ;;  %2465 = vmatmul.bf16.vlgmr.msrb.gmra.mxu2 %v5593_v35  ;;  %v4863_v4 = vld [vmem:[%s5391_s25 + $0x504] sm:$0xf0] }
  0xf1   : > { %2513 = vmatpush.bf16.msra.mxu2 %v3923_v5  ;;  %2479 = vmatmul.bf16.vlgmr.msrb.gmra.mxu3 %v5598_v39  ;;  %v3419_v5 = vor.u32 %v4719_v61, %v3418_v60  ;;  %v3995_v12 = vor.u32 %v4863_v4, %v3994_v3  ;;  %v3708_v60 = vld [vmem:[%s5391_s25 + $0x2c8] sm:$0xf0]  ;;  %v4283_v61 = vor.u32 %v4935_v52, %v4282_v51  ;;  %v4929_v3 = vld [vmem:[%s5391_s25 + $0x714] sm:$0xf0]  ;;  %v4450_v4 = vld [vmem:[%s5391_s25 + $0x880] sm:$0xf] }
  0xf2   : > { %2527 = vmatpush.bf16.msra.mxu3 %v4115_v10  ;;  %v4713_v10 = vld [vmem:[%s5391_s25 + $0x54] sm:$0xf0]  ;;  %v4911_v51 = vld [vmem:[%s5391_s25 + $0x684] sm:$0xf0]  ;;  %v4378_v52 = vld [vmem:[%s5391_s25 + $0x7f0] sm:$0xf] }
  0xf3   : > { %2486 = vmatpush.bf16.msra.mxu0 %v3515_v16  ;;  %v3970_v16 = vld [vmem:[%s5391_s25 + $0x4c0] sm:$0xf] }
  0xf4   : > { %2500 = vmatpush.bf16.msra.mxu1 %v3707_v17  ;;  %v4857_v17 = vld [vmem:[%s5391_s25 + $0x4d4] sm:$0xf0] }
  0xf5   : > { %2514 = vmatpush.bf16.msra.mxu2 %v3899_v18  ;;  %v3395_v18 = vor.u32 %v4713_v10, %v3394_v9  ;;  %v3971_v29 = vor.u32 %v4857_v17, %v3970_v16  ;;  %v3492_v9 = vld [vmem:[%s5391_s25 + $0x118] sm:$0xf0]  ;;  %v5957_v10 = vpop.f32.mrf.mxu1  ;;  %v4234_v17 = vld [vmem:[%s5391_s25 + $0x6d0] sm:$0xf] }
  0xf6   : > { %2528 = vmatpush.bf16.msra.mxu3 %v4091_v24  ;;  %v3587_v24 = vor.u32 %v4761_v13, %v3586_v11  ;;  %v4782_v11 = vld [vmem:[%s5391_s25 + $0x284] sm:$0xf]  ;;  %v4259_v13 = vor.u32 %v4929_v3, %v4258_v2  ;;  %v4162_v2 = vld [vmem:[%s5391_s25 + $0x640] sm:$0xf]  ;;  %v4905_v3 = vld [vmem:[%s5391_s25 + $0x654] sm:$0xf0] }
  0xf7   : > { %2487 = vmatpush.bf16.msra.mxu0 %v3491_v30  ;;  %v4803_v30 = vld [vmem:[%s5391_s25 + $0x324] sm:$0xf0] }
  0xf8   : > { %2501 = vmatpush.bf16.msra.mxu1 %v3683_v31  ;;  %v3946_v31 = vld [vmem:[%s5391_s25 + $0x490] sm:$0xf] }
  0xf9   : > { %2515 = vmatpush.bf16.msra.mxu2 %v3875_v32  ;;  %v4851_v32 = vld [vmem:[%s5391_s25 + $0x4a4] sm:$0xf0] }
  0xfa   : > { %2529 = vmatpush.bf16.msra.mxu3 %v4067_v37  ;;  %v4498_v37 = vld [vmem:[%s5391_s25 + $0x8e0] sm:$0xf]  ;;  %v3947_v47 = vor.u32 %v4851_v32, %v3946_v31 }
  0xfb   : > { %2488 = vmatpush.bf16.msra.mxu0 %v3467_v44  ;;  %v3755_v44 = vor.u32 %v4803_v30, %v3754_v28  ;;  %v4499_v49 = vor.u32 %v4989_v40, %v4498_v37  ;;  %v3660_v28 = vld [vmem:[%s5391_s25 + $0x268] sm:$0xf0]  ;;  %v4210_v32 = vld [vmem:[%s5391_s25 + $0x6a0] sm:$0xf]  ;;  %v4722_v40 = vld [vmem:[%s5391_s25 + $0xa4] sm:$0xf] }
  0xfc   : > { %2502 = vmatpush.bf16.msra.mxu1 %v3659_v45  ;;  %v4794_v45 = vld [vmem:[%s5391_s25 + $0x2e4] sm:$0xf]  ;;  %v3663_v37 = vor.u32 %v4776_v27, %v3660_v28  ;;  %v3372_v28 = vld [vmem:[%s5391_s25 + $0x28] sm:$0xf0] }
  0xfd   : > { %2516 = vmatpush.bf16.msra.mxu2 %v3851_v46  ;;  %v3732_v46 = vld [vmem:[%s5391_s25 + $0x2f8] sm:$0xf0] }
  0xfe   : > { %2530 = vmatpush.bf16.msra.mxu3 %v4043_v50  ;;  %v3543_v50 = vor.u32 %v4746_v41, %v3540_v42  ;;  %v3735_v54 = vor.u32 %v4794_v45, %v3732_v46  ;;  %v3444_v41 = vld [vmem:[%s5391_s25 + $0xb8] sm:$0xf0]  ;;  %v5980_v42 = vpop.f32.mrf.mxu0  ;;  %v4211_v46 = vor.u32 %v4917_v34, %v4210_v32  ;;  %v4842_v34 = vld [vmem:[%s5391_s25 + $0x464] sm:$0xf] }
  0xff   : > { %2489 = vmatpush.bf16.msra.mxu0 %v3443_v56  ;;  %v4740_v56 = vld [vmem:[%s5391_s25 + $0x134] sm:$0xf]  ;;  %v3636_v45 = vld [vmem:[%s5391_s25 + $0x238] sm:$0xf0] }
 0x100   : > { %2503 = vmatpush.bf16.msra.mxu1 %v3635_v58  ;;  %v3516_v58 = vld [vmem:[%s5391_s25 + $0x148] sm:$0xf0] }
 0x101   : > { %2517 = vmatpush.bf16.msra.mxu2 %v3827_v59  ;;  %v4788_v59 = vld [vmem:[%s5391_s25 + $0x2b4] sm:$0xf]  ;;  %v3519_v1 = vor.u32 %v4740_v56, %v3516_v58  ;;  %v3420_v56 = vld [vmem:[%s5391_s25 + $0x88] sm:$0xf0]  ;;  %v5994_v58 = vpop.f32.mrf.mxu3 }
 0x102   : > { %2531 = vmatpush.bf16.msra.mxu3 %v4019_v63  ;;  %v5948_v63 = vpop.f32.mrf.mxu2 }
 0x103   : > { %2490 = vmatpush.bf16.msra.mxu0 %v3419_v5  ;;  %v3711_v5 = vor.u32 %v4788_v59, %v3708_v60  ;;  %v4764_v59 = vld [vmem:[%s5391_s25 + $0x1f4] sm:$0xf]  ;;  %v3612_v60 = vld [vmem:[%s5391_s25 + $0x208] sm:$0xf0] }
 0x104   : > { %2504 = vmatpush.bf16.msra.mxu1 %v3611_v7  ;;  %v4977_v7 = vld [vmem:[%s5391_s25 + $0x894] sm:$0xf0] }
 0x105   : > { %2518 = vmatpush.bf16.msra.mxu2 %v3803_v8  ;;  %v4734_v8 = vld [vmem:[%s5391_s25 + $0x104] sm:$0xf]  ;;  %v4451_v15 = vor.u32 %v4977_v7, %v4450_v4  ;;  %v4354_v4 = vld [vmem:[%s5391_s25 + $0x7c0] sm:$0xf]  ;;  %v4953_v7 = vld [vmem:[%s5391_s25 + $0x7d4] sm:$0xf0] }
 0x106   : > { %2532 = vmatpush.bf16.msra.mxu3 %v3995_v12  ;;  %v3684_v12 = vld [vmem:[%s5391_s25 + $0x298] sm:$0xf0]  ;;  %v3495_v16 = vor.u32 %v4734_v8, %v3492_v9  ;;  %v4710_v8 = vld [vmem:[%s5391_s25 + $0x44] sm:$0xf] }
 0x107   : > { %2491 = vmatpush.bf16.msra.mxu0 %v3395_v18  ;;  %v4923_v18 = vld [vmem:[%s5391_s25 + $0x6e4] sm:$0xf0]  ;;  %v3687_v20 = vor.u32 %v4782_v11, %v3684_v12  ;;  %v3396_v9 = vld [vmem:[%s5391_s25 + $0x58] sm:$0xf0]  ;;  %v4758_v12 = vld [vmem:[%s5391_s25 + $0x1c4] sm:$0xf] }
 0x108   : > { %2505 = vmatpush.bf16.msra.mxu1 %v3587_v24  ;;  %v4971_v24 = vld [vmem:[%s5391_s25 + $0x864] sm:$0xf0] }
 0x109   : > { %2519 = vmatpush.bf16.msra.mxu2 %v3779_v25  ;;  %v4728_v25 = vld [vmem:[%s5391_s25 + $0xd4] sm:$0xf]  ;;  %v4427_v30 = vor.u32 %v4971_v24, %v4426_v19  ;;  %v4355_v19 = vor.u32 %v4953_v7, %v4354_v4  ;;  %v4330_v24 = vld [vmem:[%s5391_s25 + $0x790] sm:$0xf]  ;;  %v6020_v32 = vpop.f32.mrf.mxu3  ;;  %v4476_v4 = vld [vmem:[%s5391_s25 + $0x8c8] sm:$0xf0] }
 0x10a   : > { %2533 = vmatpush.bf16.msra.mxu3 %v3971_v29  ;;  %v4235_v29 = vor.u32 %v4923_v18, %v4234_v17  ;;  %v3471_v31 = vor.u32 %v4728_v25, %v3468_v26  ;;  %v4899_v17 = vld [vmem:[%s5391_s25 + $0x624] sm:$0xf0]  ;;  %v6010_v18 = vpop.f32.mrf.mxu0  ;;  %v4704_v26 = vld [vmem:[%s5391_s25 + $0x14] sm:$0xf] }
 0x10b   : > { %2492 = vmatpush.bf16.msra.mxu0 %v3371_v38  ;;  %v4965_v38 = vld [vmem:[%s5391_s25 + $0x834] sm:$0xf0]  ;;  %v4947_v25 = vld [vmem:[%s5391_s25 + $0x7a4] sm:$0xf0] }
 0x10c   : > { %2506 = vmatpush.bf16.msra.mxu1 %v3563_v43  ;;  %v5982_v43 = vpop.f32.mrf.mxu2 }
 0x10d   : > { %2520 = vmatpush.bf16.msra.mxu2 %v3755_v44  ;;  %v4770_v44 = vld [vmem:[%s5391_s25 + $0x224] sm:$0xf] }
 0x10e   : > { %2534 = vmatpush.bf16.msra.mxu3 %v3947_v47  ;;  %2493 = vmatmul.bf16.vlgmr.msra.gmra.mxu0 %v5494_v57  ;;  %v5986_v47 = vpop.f32.mrf.mxu1  ;;  %v3639_v53 = vor.u32 %v4770_v44, %v3636_v45  ;;  %v4308_v44 = vld [vmem:[%s5391_s25 + $0x778] sm:$0xf0]  ;;  %v4331_v45 = vor.u32 %v4947_v25, %v4330_v24  ;;  %v4974_v25 = vld [vmem:[%s5391_s25 + $0x884] sm:$0xf] }
 0x10f   : > { %2541 = vmatpush.bf16.msrb.mxu0 %v4307_v48  ;;  %2507 = vmatmul.bf16.vlgmr.msra.gmra.mxu1 %v5510_v6  ;;  %v4403_v48 = vor.u32 %v4965_v38, %v4402_v36  ;;  %v3924_v36 = vld [vmem:[%s5391_s25 + $0x478] sm:$0xf0] }
 0x110   : > { %2555 = vmatpush.bf16.msrb.mxu1 %v4499_v49  ;;  %2521 = vmatmul.bf16.vlgmr.msra.gmra.mxu2 %v5532_v22  ;;  %v3447_v49 = vor.u32 %v4722_v40, %v3444_v41  ;;  %v4116_v40 = vld [vmem:[%s5391_s25 + $0x5f8] sm:$0xf0]  ;;  %v4938_v41 = vld [vmem:[%s5391_s25 + $0x764] sm:$0xf] }
 0x111   : > { %2569 = vmatpush.bf16.msrb.mxu2 %v3543_v50  ;;  %2535 = vmatmul.bf16.vlgmr.msra.gmra.mxu3 %v5534_v23  ;;  %v4186_v50 = vld [vmem:[%s5391_s25 + $0x670] sm:$0xf]  ;;  %v6051_v24 = vpop.f32.mrf.mxu3 }
 0x112   : > { %2583 = vmatpush.bf16.msrb.mxu3 %v3735_v54  ;;  %v4959_v54 = vld [vmem:[%s5391_s25 + $0x804] sm:$0xf0] }
 0x113   : > { %2542 = vmatpush.bf16.msrb.mxu0 %v4283_v61  ;;  %v4187_v61 = vor.u32 %v4911_v51, %v4186_v50  ;;  %v3927_v51 = vor.u32 %v4842_v34, %v3924_v36  ;;  %v3852_v34 = vld [vmem:[%s5391_s25 + $0x3e8] sm:$0xf0]  ;;  %v4872_v36 = vld [vmem:[%s5391_s25 + $0x554] sm:$0xf] }
 0x114   : > { %2556 = vmatpush.bf16.msrb.mxu1 %v4475_v0  ;;  %v4379_v0 = vor.u32 %v4959_v54, %v4378_v52  ;;  %v6004_v11 = vpop.f32.mrf.mxu2  ;;  %v4836_v54 = vld [vmem:[%s5391_s25 + $0x434] sm:$0xf] }
 0x115   : > { %2570 = vmatpush.bf16.msrb.mxu2 %v3519_v1  ;;  %v3423_v1 = vor.u32 %v4716_v55, %v3420_v56  ;;  %v3900_v55 = vld [vmem:[%s5391_s25 + $0x448] sm:$0xf0]  ;;  %v4884_v56 = vld [vmem:[%s5391_s25 + $0x5b4] sm:$0xf] }
 0x116   : > { %2584 = vmatpush.bf16.msrb.mxu3 %v3711_v5  ;;  %v3615_v5 = vor.u32 %v4764_v59, %v3612_v60  ;;  %v4092_v60 = vld [vmem:[%s5391_s25 + $0x5c8] sm:$0xf0] }
 0x117   : > { %2543 = vmatpush.bf16.msrb.mxu0 %v4259_v13  ;;  %v3588_v13 = vld [vmem:[%s5391_s25 + $0x1d8] sm:$0xf0] }
 0x118   : > { %2557 = vmatpush.bf16.msrb.mxu1 %v4451_v15  ;;  %v4163_v15 = vor.u32 %v4905_v3, %v4162_v2  ;;  %v3591_v27 = vor.u32 %v4758_v12, %v3588_v13  ;;  %v6038_v2 = vpop.f32.mrf.mxu0  ;;  %v4980_v3 = vld [vmem:[%s5391_s25 + $0x8b4] sm:$0xf]  ;;  %v4830_v12 = vld [vmem:[%s5391_s25 + $0x404] sm:$0xf]  ;;  %v3876_v13 = vld [vmem:[%s5391_s25 + $0x418] sm:$0xf0] }
 0x119   : > { %2571 = vmatpush.bf16.msrb.mxu2 %v3495_v16  ;;  %v4138_v16 = vld [vmem:[%s5391_s25 + $0x610] sm:$0xf] }
 0x11a   : > { %2585 = vmatpush.bf16.msrb.mxu3 %v3687_v20  ;;  %v3399_v20 = vor.u32 %v4710_v8, %v3396_v9  ;;  %v4139_v38 = vor.u32 %v4899_v17, %v4138_v16  ;;  %v4095_v8 = vor.u32 %v4884_v56, %v4092_v60  ;;  %v4479_v16 = vor.u32 %v4980_v3, %v4476_v4  ;;  %v4068_v17 = vld [vmem:[%s5391_s25 + $0x598] sm:$0xf0]  ;;  %v4962_v60 = vld [vmem:[%s5391_s25 + $0x824] sm:$0xf]  ;;  %v6087_v3 = vpop.f32.mrf.mxu3 }
 0x11b   : > { %2544 = vmatpush.bf16.msrb.mxu0 %v4235_v29  ;;  %v4752_v29 = vld [vmem:[%s5391_s25 + $0x194] sm:$0xf]  ;;  %v4212_v56 = vld [vmem:[%s5391_s25 + $0x6b8] sm:$0xf0] }
 0x11c   : > { %2558 = vmatpush.bf16.msrb.mxu1 %v4427_v30  ;;  %v3564_v30 = vld [vmem:[%s5391_s25 + $0x1a8] sm:$0xf0] }
 0x11d   : > { %2572 = vmatpush.bf16.msrb.mxu2 %v3471_v31  ;;  %v6018_v31 = vpop.f32.mrf.mxu1  ;;  %v3567_v50 = vor.u32 %v4752_v29, %v3564_v30  ;;  %v4824_v30 = vld [vmem:[%s5391_s25 + $0x3d4] sm:$0xf] }
 0x11e   : > { %2586 = vmatpush.bf16.msrb.mxu3 %v3663_v37  ;;  %v4890_v37 = vld [vmem:[%s5391_s25 + $0x5e4] sm:$0xf] }
 0x11f   : > { %2545 = vmatpush.bf16.msrb.mxu0 %v4211_v46  ;;  %v3375_v46 = vor.u32 %v4704_v26, %v3372_v28  ;;  %v4119_v52 = vor.u32 %v4890_v37, %v4116_v40  ;;  %v4452_v26 = vld [vmem:[%s5391_s25 + $0x898] sm:$0xf0]  ;;  %v4044_v37 = vld [vmem:[%s5391_s25 + $0x568] sm:$0xf0] }
 0x120   : > { %2559 = vmatpush.bf16.msrb.mxu1 %v4403_v48  ;;  %v4986_v48 = vld [vmem:[%s5391_s25 + $0x8e4] sm:$0xf]  ;;  %v4236_v40 = vld [vmem:[%s5391_s25 + $0x6e8] sm:$0xf0] }
 0x121   : > { %2573 = vmatpush.bf16.msrb.mxu2 %v3447_v49  ;;  %v4500_v49 = vld [vmem:[%s5391_s25 + $0x8f8] sm:$0xf0] }
 0x122   : > { %2587 = vmatpush.bf16.msrb.mxu3 %v3639_v53  ;;  %v4311_v53 = vor.u32 %v4938_v41, %v4308_v44  ;;  %v4503_v59 = vor.u32 %v4986_v48, %v4500_v49  ;;  %v4968_v41 = vld [vmem:[%s5391_s25 + $0x854] sm:$0xf]  ;;  %v4428_v44 = vld [vmem:[%s5391_s25 + $0x868] sm:$0xf0]  ;;  %v4047_v48 = vor.u32 %v4872_v36, %v4044_v37  ;;  %v4902_v37 = vld [vmem:[%s5391_s25 + $0x644] sm:$0xf] }
 0x123   : > { %2546 = vmatpush.bf16.msrb.mxu0 %v4187_v61  ;;  %v4932_v61 = vld [vmem:[%s5391_s25 + $0x734] sm:$0xf] }
 0x124   : > { %2560 = vmatpush.bf16.msrb.mxu1 %v4379_v0  ;;  %v4284_v0 = vld [vmem:[%s5391_s25 + $0x748] sm:$0xf0] }
 0x125   : > { %2574 = vmatpush.bf16.msrb.mxu2 %v3423_v1  ;;  %v6036_v1 = vpop.f32.mrf.mxu2  ;;  %v6042_v7 = vpop.f32.mrf.mxu1  ;;  %v4287_v9 = vor.u32 %v4932_v61, %v4284_v0  ;;  %v4404_v61 = vld [vmem:[%s5391_s25 + $0x838] sm:$0xf0] }
 0x126   : > { %2588 = vmatpush.bf16.msrb.mxu3 %v3615_v5  ;;  %v3903_v5 = vor.u32 %v4836_v54, %v3900_v55  ;;  %v4020_v54 = vld [vmem:[%s5391_s25 + $0x538] sm:$0xf0]  ;;  %v4914_v55 = vld [vmem:[%s5391_s25 + $0x6a4] sm:$0xf] }
 0x127   : > { %2547 = vmatpush.bf16.msrb.mxu0 %v4163_v15  ;;  %v4878_v15 = vld [vmem:[%s5391_s25 + $0x584] sm:$0xf] }
 0x128   : > { %2561 = vmatpush.bf16.msrb.mxu1 %v4355_v19  ;;  %v4926_v19 = vld [vmem:[%s5391_s25 + $0x704] sm:$0xf]  ;;  %v4071_v28 = vor.u32 %v4878_v15, %v4068_v17  ;;  %v3996_v15 = vld [vmem:[%s5391_s25 + $0x508] sm:$0xf0] }
 0x129   : > { %2575 = vmatpush.bf16.msrb.mxu2 %v3399_v20  ;;  %v4260_v20 = vld [vmem:[%s5391_s25 + $0x718] sm:$0xf0]  ;;  %v4188_v17 = vld [vmem:[%s5391_s25 + $0x688] sm:$0xf0] }
 0x12a   : > { %2589 = vmatpush.bf16.msrb.mxu3 %v3591_v27  ;;  %v3879_v27 = vor.u32 %v4830_v12, %v3876_v13  ;;  %v4263_v29 = vor.u32 %v4926_v19, %v4260_v20  ;;  %v4860_v12 = vld [vmem:[%s5391_s25 + $0x4f4] sm:$0xf]  ;;  %v4407_v13 = vor.u32 %v4962_v60, %v4404_v61  ;;  %v4380_v20 = vld [vmem:[%s5391_s25 + $0x808] sm:$0xf0]  ;;  %v6124_v61 = vpop.f32.mrf.mxu3 }
 0x12b   : > { %2548 = vmatpush.bf16.msrb.mxu0 %v4139_v38  ;;  %v4920_v38 = vld [vmem:[%s5391_s25 + $0x6d4] sm:$0xf]  ;;  %v4140_v60 = vld [vmem:[%s5391_s25 + $0x628] sm:$0xf0] }
 0x12c   : > { %2562 = vmatpush.bf16.msrb.mxu1 %v4331_v45  ;;  %v4239_v49 = vor.u32 %v4920_v38, %v4236_v40  ;;  %v4956_v19 = vld [vmem:[%s5391_s25 + $0x7f4] sm:$0xf]  ;;  %v4164_v38 = vld [vmem:[%s5391_s25 + $0x658] sm:$0xf0] }
 0x12d   : > { %2576 = vmatpush.bf16.msrb.mxu2 %v3375_v46  ;;  %v6067_v45 = vpop.f32.mrf.mxu2  ;;  %v6069_v46 = vpop.f32.mrf.mxu0  ;;  %v4383_v36 = vor.u32 %v4956_v19, %v4380_v20  ;;  %v5013_v19 = vld [vmem:[%s6131_s27 + $0xb8] sm:$0xff] }
 0x12e   : > { %2590 = vmatpush.bf16.msrb.mxu3 %v3567_v50  ;;  %2549 = vmatmul.bf16.vlgmr.msrb.gmra.mxu0 %v5593_v35  ;;  %v4818_v50 = vld [vmem:[%s5391_s25 + $0x3a4] sm:$0xf] }
 0x12f   : > { %2597 = vmatpush.bf16.msra.mxu0 %v3927_v51  ;;  %2563 = vmatmul.bf16.vlgmr.msrb.gmra.mxu1 %v5598_v39  ;;  %v3828_v51 = vld [vmem:[%s5391_s25 + $0x3b8] sm:$0xf0] }
 0x130   : > { %2611 = vmatpush.bf16.msra.mxu1 %v4119_v52  ;;  %2577 = vmatmul.bf16.vlgmr.msrb.gmra.mxu2 %v5494_v57  ;;  %v4455_v57 = vor.u32 %v4974_v25, %v4452_v26  ;;  %v4866_v52 = vld [vmem:[%s5391_s25 + $0x524] sm:$0xf]  ;;  %v3831_v0 = vor.u32 %v4818_v50, %v3828_v51  ;;  %v3999_v26 = vor.u32 %v4860_v12, %v3996_v15  ;;  %v4800_v51 = vld [vmem:[%s5391_s25 + $0x314] sm:$0xf]  ;;  %v4997_v15 = vld [vmem:[%s6131_s27 + $0x38] sm:$0xff] }
 0x131   : > { %2625 = vmatpush.bf16.msra.mxu2 %v4311_v53  ;;  %2591 = vmatmul.bf16.vlgmr.msrb.gmra.mxu3 %v5510_v6  ;;  %v3855_v6 = vor.u32 %v4824_v30, %v3852_v34  ;;  %v4431_v53 = vor.u32 %v4968_v41, %v4428_v44  ;;  %v4023_v4 = vor.u32 %v4866_v52, %v4020_v54  ;;  %v3780_v30 = vld [vmem:[%s5391_s25 + $0x358] sm:$0xf0]  ;;  %v4854_v34 = vld [vmem:[%s5391_s25 + $0x4c4] sm:$0xf]  ;;  %v3756_v52 = vld [vmem:[%s5391_s25 + $0x328] sm:$0xf0] }
 0x132   : > { %2639 = vmatpush.bf16.msra.mxu3 %v4503_v59  ;;  %v6077_v59 = vpop.f32.mrf.mxu1  ;;  %v4950_v41 = vld [vmem:[%s5391_s25 + $0x7c4] sm:$0xf]  ;;  %v4356_v44 = vld [vmem:[%s5391_s25 + $0x7d8] sm:$0xf0]  ;;  %v4167_v50 = vor.u32 %v4902_v37, %v4164_v38  ;;  %v5004_v37 = vld [vmem:[%s6131_s27 + $0x70] sm:$0xff] }
 0x133   : > { %2598 = vmatpush.bf16.msra.mxu0 %v3903_v5  ;;  %v4215_v5 = vor.u32 %v4914_v55, %v4212_v56  ;;  %v4359_v54 = vor.u32 %v4950_v41, %v4356_v44  ;;  %v3948_v55 = vld [vmem:[%s5391_s25 + $0x4a8] sm:$0xf0]  ;;  %v4896_v56 = vld [vmem:[%s5391_s25 + $0x614] sm:$0xf] }
 0x134   : > { %2612 = vmatpush.bf16.msra.mxu1 %v4095_v8  ;;  %v4812_v8 = vld [vmem:[%s5391_s25 + $0x374] sm:$0xf]  ;;  %v4143_v12 = vor.u32 %v4896_v56, %v4140_v60  ;;  %v2368_v41 = vpop.f32.mrf.mxu3  ;;  %v5010_v56 = vld [vmem:[%s6131_s27 + $0xa0] sm:$0xff] }
 0x135   : > { %2626 = vmatpush.bf16.msra.mxu2 %v4287_v9  ;;  %v3804_v9 = vld [vmem:[%s5391_s25 + $0x388] sm:$0xf0]  ;;  %v6111_v40 = vpop.f32.mrf.mxu2  ;;  %v5012_v38 = vld [vmem:[%s6131_s27 + $0xb0] sm:$0xff] }
 0x136   : > { %2640 = vmatpush.bf16.msra.mxu3 %v4479_v16  ;;  %v4908_v16 = vld [vmem:[%s5391_s25 + $0x674] sm:$0xf]  ;;  %v3807_v25 = vor.u32 %v4812_v8, %v3804_v9  ;;  %v3759_v8 = vor.u32 %v4800_v51, %v3756_v52 }
 0x137   : > { %2599 = vmatpush.bf16.msra.mxu0 %v3879_v27  ;;  %v4191_v27 = vor.u32 %v4908_v16, %v4188_v17  ;;  %v5005_v17 = vld [vmem:[%s6131_s27 + $0x78] sm:$0xff] }
 0x138   : > { %2613 = vmatpush.bf16.msra.mxu1 %v4071_v28  ;;  %v6103_v28 = vpop.f32.mrf.mxu0 }
 0x139   : > { %2627 = vmatpush.bf16.msra.mxu2 %v4263_v29  ;;  %v4806_v29 = vld [vmem:[%s5391_s25 + $0x344] sm:$0xf] }
 0x13a   : > { %2641 = vmatpush.bf16.msra.mxu3 %v4455_v57  ;;  %v3972_v57 = vld [vmem:[%s5391_s25 + $0x4d8] sm:$0xf0] }
 0x13b   : > { %2600 = vmatpush.bf16.msra.mxu0 %v3855_v6  ;;  %v6115_v6 = vpop.f32.mrf.mxu1 }
 0x13c   : > { %2614 = vmatpush.bf16.msra.mxu1 %v4047_v48  ;;  %v3783_v48 = vor.u32 %v4806_v29, %v3780_v30  ;;  %v4996_v30 = vld [vmem:[%s6131_s27 + $0x30] sm:$0xff] }
 0x13d   : > { %2628 = vmatpush.bf16.msra.mxu2 %v4239_v49  ;;  %v3975_v49 = vor.u32 %v4854_v34, %v3972_v57  ;;  %v5021_v34 = vld [vmem:[%s6131_s27 + $0xf8] sm:$0xff] }
 0x13e   : > { %2642 = vmatpush.bf16.msra.mxu3 %v4431_v53  ;;  %v4848_v53 = vld [vmem:[%s5391_s25 + $0x494] sm:$0xf] }
 0x13f   : > { %2601 = vmatpush.bf16.msra.mxu0 %v3831_v0  ;;  %v4944_v0 = vld [vmem:[%s5391_s25 + $0x794] sm:$0xf]  ;;  %v3951_v9 = vor.u32 %v4848_v53, %v3948_v55 }
 0x140   : > { %2615 = vmatpush.bf16.msra.mxu1 %v4023_v4  ;;  %v4332_v4 = vld [vmem:[%s5391_s25 + $0x7a8] sm:$0xf0]  ;;  %v2328_v20 = vpop.f32.mrf.mxu0  ;;  %s313_s25 = scalar_lea.vmem [#allocation6], %s5387_s26  ;;  %s4701_s26 = sshll.u32 %s6277_s21, 4 }
 0x141   : > { %2629 = vmatpush.bf16.msra.mxu2 %v4215_v5  ;;  %v6134_v5 = vld [vmem:[%s5400_s18] sm:$0x3f]  ;;  %s387_s24 = scalar_lea.vmem %s6253_s5, %s4701_s26 }
 0x142   : > { %2643 = vmatpush.bf16.msra.mxu3 %v4407_v13  ;;  %v4335_v13 = vor.u32 %v4944_v0, %v4332_v4  ;;  %v697_v16 = vperm.slane %v6134_v5, 0  ;;  %v698_v29 = vperm.slane %v6134_v5, 1 }
 0x143   : > { %2602 = vmatpush.bf16.msra.mxu0 %v3807_v25  ;;  %v2354_v25 = vpop.f32.mrf.mxu2 }
 0x144   : > { %2616 = vmatpush.bf16.msra.mxu1 %v3999_v26  ;;  %v699_v26 = vperm.slane %v6134_v5, 2  ;;  %v2161_v57 = vadd.f32 %v5946_v62, %v697_v16  ;;  %v2245_v62 = vadd.f32 %v6036_v1, %v698_v29 }
 0x145   : > { %2630 = vmatpush.bf16.msra.mxu2 %v4191_v27  ;;  %v2342_v27 = vpop.f32.mrf.mxu1 }
 0x146   : > { %2644 = vmatpush.bf16.msra.mxu3 %v4383_v36  ;;  %v2159_v36 = vadd.f32 %v5920_v21, %v697_v16  ;;  %v2327_v44 = vadd.f32 %v6103_v28, %v699_v26  ;;  %v2243_v21 = vadd.f32 %v6004_v11, %v698_v29  ;;  %v5020_v28 = vld [vmem:[%s6131_s27 + $0xf0] sm:$0xff]  ;;  %v2259_v53 = vadd.f32 %v6051_v24, %v2245_v62  ;;  %v2370_v24 = vpop.f32.mrf.mxu3  ;;  %v5015_v62 = vld [vmem:[%s6131_s27 + $0xc8] sm:$0xff] }
 0x147   : > { %2603 = vmatpush.bf16.msra.mxu0 %v3783_v48  ;;  %v2329_v48 = vadd.f32 %v2328_v20, %v699_v26  ;;  %v4992_v20 = vld [vmem:[%s6131_s27 + $0x10] sm:$0xff] }
 0x148   : > { %2617 = vmatpush.bf16.msra.mxu1 %v3975_v49  ;;  %v4995_v49 = vld [vmem:[%s6131_s27 + $0x28] sm:$0xff]  ;;  %v2257_v52 = vadd.f32 %v6020_v32, %v2243_v21  ;;  %v5000_v26 = vld [vmem:[%s6131_s27 + $0x50] sm:$0xff] }
 0x149   : > { %2631 = vmatpush.bf16.msra.mxu2 %v4167_v50  ;;  %v2175_v50 = vadd.f32 %v5957_v10, %v2161_v57  ;;  %v2343_v11 = vadd.f32 %v2342_v27, %v2329_v48  ;;  %v5008_v27 = vld [vmem:[%s6131_s27 + $0x90] sm:$0xff]  ;;  %v4990_v48 = vld [vmem:[%s6131_s27] sm:$0xff] }
 0x14a   : > { %2645 = vmatpush.bf16.msra.mxu3 %v4359_v54  ;;  %v4994_v54 = vld [vmem:[%s6131_s27 + $0x20] sm:$0xff]  ;;  %v2271_v4 = vadd.f32 %v6038_v2, %v2257_v52 }
 0x14b   : > { %2604 = vmatpush.bf16.msra.mxu0 %v3759_v8  ;;  %v2382_v1 = vpop.f32.mrf.mxu0  ;;  %v2356_v51 = vpop.f32.mrf.mxu2  ;;  %v2189_v55 = vadd.f32 %v5982_v43, %v2175_v50  ;;  %v2273_v8 = vadd.f32 %v6069_v46, %v2259_v53 }
 0x14c   : > { %2618 = vmatpush.bf16.msra.mxu1 %v3951_v9  ;;  %v2357_v0 = vadd.f32 %v2356_v51, %v2343_v11  ;;  %v4993_v9 = vld [vmem:[%s6131_s27 + $0x18] sm:$0xff]  ;;  %v2285_v46 = vadd.f32 %v6042_v7, %v2271_v4  ;;  %v5014_v11 = vld [vmem:[%s6131_s27 + $0xc0] sm:$0xff] }
 0x14d   : > { %2632 = vmatpush.bf16.msra.mxu2 %v4143_v12  ;;  %v2396_v60 = vpop.f32.mrf.mxu1  ;;  %v2203_v12 = vadd.f32 %v5994_v58, %v2189_v55 }
 0x14e   : > { %2646 = vmatpush.bf16.msra.mxu3 %v4335_v13  ;;  %2605 = vmatmul.bf16.vlgmr.msra.gmra.mxu0 %v5532_v22  ;;  %v2173_v22 = vadd.f32 %v5928_v33, %v2159_v36  ;;  %v5019_v33 = vld [vmem:[%s6131_s27 + $0xe8] sm:$0xff]  ;;  %v5001_v13 = vld [vmem:[%s6131_s27 + $0x58] sm:$0xff]  ;;  %v2371_v2 = vadd.f32 %v2370_v24, %v2357_v0 }
 0x14f   : > { %3059 = vmatpush.bf16.msrb.mxu0 %v4997_v15  ;;  %2619 = vmatmul.bf16.vlgmr.msra.gmra.mxu1 %v5534_v23  ;;  %v5003_v23 = vld [vmem:[%s6131_s27 + $0x68] sm:$0xff]  ;;  %v5009_v15 = vld [vmem:[%s6131_s27 + $0x98] sm:$0xff] }
 0x150   : > { %3073 = vmatpush.bf16.msrb.mxu1 %v5005_v17  ;;  %2633 = vmatmul.bf16.vlgmr.msra.gmra.mxu2 %v5593_v35  ;;  %v5011_v35 = vld [vmem:[%s6131_s27 + $0xa8] sm:$0xff]  ;;  %v2187_v10 = vadd.f32 %v5948_v63, %v2173_v22  ;;  %v5018_v63 = vld [vmem:[%s6131_s27 + $0xe0] sm:$0xff] }
 0x151   : > { %3087 = vmatpush.bf16.msrb.mxu2 %v5013_v19  ;;  %2647 = vmatmul.bf16.vlgmr.msra.gmra.mxu3 %v5598_v39  ;;  %v2341_v39 = vadd.f32 %v6115_v6, %v2327_v44  ;;  %v5002_v6 = vld [vmem:[%s6131_s27 + $0x60] sm:$0xff]  ;;  %v2287_v19 = vadd.f32 %v6077_v59, %v2273_v8  ;;  %v4991_v36 = vld [vmem:[%s6131_s27 + $0x8] sm:$0xff] }
 0x152   : > { %3101 = vmatpush.bf16.msrb.mxu3 %v5021_v34  ;;  %v2201_v43 = vadd.f32 %v5964_v14, %v2187_v10  ;;  %v5017_v14 = vld [vmem:[%s6131_s27 + $0xd8] sm:$0xff]  ;;  %v2299_v34 = vadd.f32 %v6067_v45, %v2285_v46 }
 0x153   : > { %3060 = vmatpush.bf16.msrb.mxu0 %v4996_v30  ;;  %v2355_v32 = vadd.f32 %v2354_v25, %v2341_v39  ;;  %v2384_v17 = vpop.f32.mrf.mxu0  ;;  %v2217_v25 = vadd.f32 %v6010_v18, %v2203_v12  ;;  %v2301_v7 = vadd.f32 %v6111_v40, %v2287_v19  ;;  %v5007_v40 = vld [vmem:[%s6131_s27 + $0x88] sm:$0xff]  ;;  %v2410_v21 = vpop.f32.mrf.mxu2  ;;  %v700_v39 = vperm.slane %v6134_v5, 3 }
 0x154   : > { %3074 = vmatpush.bf16.msrb.mxu1 %v5004_v37  ;;  %v2215_v58 = vadd.f32 %v5980_v42, %v2201_v43  ;;  %v2385_v59 = vadd.f32 %v2384_v17, %v2371_v2  ;;  %v5016_v42 = vld [vmem:[%s6131_s27 + $0xd0] sm:$0xff]  ;;  %v4999_v37 = vld [vmem:[%s6131_s27 + $0x48] sm:$0xff]  ;;  %v2313_v44 = vadd.f32 %v6087_v3, %v2299_v34  ;;  %v2424_v22 = vpop.f32.mrf.mxu3  ;;  %v701_v34 = vperm.slane %v6134_v5, 4 }
 0x155   : > { %3088 = vmatpush.bf16.msrb.mxu2 %v5012_v38  ;;  %v2369_v16 = vadd.f32 %v2368_v41, %v2355_v32  ;;  %v2398_v30 = vpop.f32.mrf.mxu1  ;;  %v2231_v57 = vadd.f32 %v6018_v31, %v2217_v25  ;;  %v2315_v38 = vadd.f32 %v6124_v61, %v2301_v7  ;;  %v2411_v52 = vadd.f32 %v2410_v21, %v700_v39  ;;  %v5023_v7 = vld [vmem:[%s6131_s27 + $0x108] sm:$0xff] }
 0x156   : > { %3102 = vmatpush.bf16.msrb.mxu3 %v5020_v28  ;;  %v2229_v18 = vadd.f32 %v5986_v47, %v2215_v58  ;;  %v2399_v41 = vadd.f32 %v2398_v30, %v2385_v59  ;;  %v5006_v28 = vld [vmem:[%s6131_s27 + $0x80] sm:$0xff]  ;;  %v5035_v21 = vld [vmem:[%s6131_s27 + $0x168] sm:$0xff] }
 0x157   : > { %3061 = vmatpush.bf16.msrb.mxu0 %v4995_v49  ;;  %v2383_v29 = vadd.f32 %v2382_v1, %v2369_v16  ;;  %v2659_v31 = vmax.f32 %v2231_v57, 0.0  ;;  %v4998_v49 = vld [vmem:[%s6131_s27 + $0x40] sm:$0xff]  ;;  %v2660_v50 = vmax.f32 %v2315_v38, 0.0  ;;  %v5036_v57 = vld [vmem:[%s6131_s27 + $0x170] sm:$0xff] }
 0x158   : > { %3075 = vmatpush.bf16.msrb.mxu1 %v5003_v23  ;;  %v2653_v47 = vmax.f32 %v2229_v18, 0.0  ;;  %v2661_v23 = vmax.f32 %v2399_v41, 0.0  ;;  %v5022_v30 = vld [vmem:[%s6131_s27 + $0x100] sm:$0xff] }
 0x159   : > { %3089 = vmatpush.bf16.msrb.mxu2 %v5011_v35  ;;  %v2397_v45 = vadd.f32 %v2396_v60, %v2383_v29  ;;  %v2654_v35 = vmax.f32 %v2313_v44, 0.0  ;;  %v5028_v60 = vld [vmem:[%s6131_s27 + $0x130] sm:$0xff] }
 0x15a   : > { %3103 = vmatpush.bf16.msrb.mxu3 %v5019_v33  ;;  %v2665_v3 = vpack.c.bf16 %v2659_v31, %v2653_v47  ;;  %v2425_v33 = vadd.f32 %v2424_v22, %v2411_v52  ;;  %v5034_v22 = vld [vmem:[%s6131_s27 + $0x160] sm:$0xff] }
 0x15b   : > { %3062 = vmatpush.bf16.msrb.mxu0 %v4994_v54  ;;  %v2655_v61 = vmax.f32 %v2397_v45, 0.0  ;;  %v2666_v1 = vpack.c.bf16 %v2660_v50, %v2654_v35  ;;  %v2412_v53 = vpop.f32.mrf.mxu2  ;;  %v5033_v35 = vld [vmem:[%s6131_s27 + $0x158] sm:$0xff] }
 0x15c   : > { %3076 = vmatpush.bf16.msrb.mxu1 %v5002_v6  ;;  %v2426_v54 = vpop.f32.mrf.mxu3  ;;  %v5029_v6 = vld [vmem:[%s6131_s27 + $0x138] sm:$0xff] }
 0x15d   : > { %3090 = vmatpush.bf16.msrb.mxu2 %v5010_v56  ;;  %v2667_v51 = vpack.c.bf16 %v2661_v23, %v2655_v61  ;;  %v2413_v56 = vadd.f32 %v2412_v53, %v700_v39 }
 0x15e   : > { %3104 = vmatpush.bf16.msrb.mxu3 %v5018_v63  ;;  %v5027_v63 = vld [vmem:[%s6131_s27 + $0x128] sm:$0xff] }
 0x15f   : > { %3063 = vmatpush.bf16.msrb.mxu0 %v4993_v9  ;;  %v2427_v0 = vadd.f32 %v2426_v54, %v2413_v56 }
 0x160   : > { %3077 = vmatpush.bf16.msrb.mxu1 %v5001_v13  ;;  %v5026_v13 = vld [vmem:[%s6131_s27 + $0x120] sm:$0xff] }
 0x161   : > { %3091 = vmatpush.bf16.msrb.mxu2 %v5009_v15 }
 0x162   : > { %3105 = vmatpush.bf16.msrb.mxu3 %v5017_v14 }
 0x163   : > { %3064 = vmatpush.bf16.msrb.mxu0 %v4992_v20 }
 0x164   : > { %3078 = vmatpush.bf16.msrb.mxu1 %v5000_v26  ;;  %v5025_v26 = vld [vmem:[%s6131_s27 + $0x118] sm:$0xff] }
 0x165   : > { %3092 = vmatpush.bf16.msrb.mxu2 %v5008_v27  ;;  %v5024_v27 = vld [vmem:[%s6131_s27 + $0x110] sm:$0xff] }
 0x166   : > { %3106 = vmatpush.bf16.msrb.mxu3 %v5016_v42 }
 0x167   : > { %3065 = vmatpush.bf16.msrb.mxu0 %v4991_v36  ;;  %v5037_v36 = vld [vmem:[%s6131_s27 + $0x178] sm:$0xff] }
 0x168   : > { %3079 = vmatpush.bf16.msrb.mxu1 %v4999_v37 }
 0x169   : > { %3093 = vmatpush.bf16.msrb.mxu2 %v5007_v40 }
 0x16a   : > { %3107 = vmatpush.bf16.msrb.mxu3 %v5015_v62 }
 0x16b   : > { %3066 = vmatpush.bf16.msrb.mxu0 %v4990_v48  ;;  %v2438_v10 = vpop.f32.mrf.mxu0 }
 0x16c   : > { %3080 = vmatpush.bf16.msrb.mxu1 %v4998_v49  ;;  %v2452_v55 = vpop.f32.mrf.mxu1  ;;  %v2439_v32 = vadd.f32 %v2438_v10, %v2425_v33  ;;  %v5031_v33 = vld [vmem:[%s6131_s27 + $0x148] sm:$0xff] }
 0x16d   : > { %3094 = vmatpush.bf16.msrb.mxu2 %v5006_v28 }
 0x16e   : > { %3067 = vmatmul.bf16.vlgmr.msrb.gmra.mxu0 %v2665_v3  ;;  %3108 = vmatpush.bf16.msrb.mxu3 %v5014_v11  ;;  %v2453_v4 = vadd.f32 %v2452_v55, %v2439_v32  ;;  %v5030_v55 = vld [vmem:[%s6131_s27 + $0x140] sm:$0xff] }
 0x16f   : > { %3081 = vmatmul.bf16.vlgmr.msrb.gmra.mxu1 %v2666_v1  ;;  %3115 = vmatpush.bf16.msra.mxu0 %v5029_v6 }
 0x170   : > { %3095 = vmatmul.bf16.vlgmr.msrb.gmra.mxu2 %v2667_v51  ;;  %3129 = vmatpush.bf16.msra.mxu1 %v5037_v36  ;;  %v5032_v51 = vld [vmem:[%s6131_s27 + $0x150] sm:$0xff] }
 0x173   : > { %v2466_v24 = vpop.f32.mrf.mxu2  ;;  %3116 = vmatpush.bf16.msra.mxu0 %v5028_v60  ;;  %v2440_v8 = vpop.f32.mrf.mxu0  ;;  %v702_v60 = vperm.slane %v6134_v5, 5 }
 0x174   : > { %v2480_v9 = vpop.f32.mrf.mxu3  ;;  %v2441_v43 = vadd.f32 %v2440_v8, %v2427_v0  ;;  %v2454_v12 = vpop.f32.mrf.mxu1  ;;  %v2467_v15 = vadd.f32 %v2466_v24, %v2453_v4  ;;  %3130 = vmatpush.bf16.msra.mxu1 %v5036_v57 }
 0x176   : > { %v2455_v16 = vadd.f32 %v2454_v12, %v2441_v43  ;;  %v2481_v17 = vadd.f32 %v2480_v9, %v2467_v15 }
 0x177   : > { %3117 = vmatpush.bf16.msra.mxu0 %v5027_v63 }
 0x178   : > { %v2656_v14 = vmax.f32 %v2481_v17, 0.0  ;;  %3131 = vmatpush.bf16.msra.mxu1 %v5035_v21 }
 0x17b   : > { %v2468_v2 = vpop.f32.mrf.mxu2  ;;  %3118 = vmatpush.bf16.msra.mxu0 %v5026_v13 }
 0x17c   : > { %v2469_v46 = vadd.f32 %v2468_v2, %v2455_v16  ;;  %v2482_v19 = vpop.f32.mrf.mxu3  ;;  %3132 = vmatpush.bf16.msra.mxu1 %v5034_v22 }
 0x17e   : > { %v2483_v20 = vadd.f32 %v2482_v19, %v2469_v46 }
 0x17f   : > { %3119 = vmatpush.bf16.msra.mxu0 %v5025_v26 }
 0x180   : > { %v2662_v58 = vmax.f32 %v2483_v20, 0.0  ;;  %3133 = vmatpush.bf16.msra.mxu1 %v5033_v35 }
 0x182   : > { %v2668_v25 = vpack.c.bf16 %v2662_v58, %v2656_v14 }
 0x183   : > { %3120 = vmatpush.bf16.msra.mxu0 %v5024_v27 }
 0x184   : > { %3109 = vmatmul.bf16.vlgmr.msrb.gmra.mxu3 %v2668_v25  ;;  %3134 = vmatpush.bf16.msra.mxu1 %v5032_v51 }
 0x187   : > { %3121 = vmatpush.bf16.msra.mxu0 %v5023_v7 }
 0x188   : > { %3135 = vmatpush.bf16.msra.mxu1 %v5031_v33 }
 0x18b   : > { %v2494_v29 = vpop.f32.mrf.mxu0  ;;  %3122 = vmatpush.bf16.msra.mxu0 %v5022_v30 }
 0x18c   : > { %v2508_v59 = vpop.f32.mrf.mxu1  ;;  %v2495_v42 = vadd.f32 %v2494_v29, %v701_v34  ;;  %3136 = vmatpush.bf16.msra.mxu1 %v5030_v55 }
 0x18e   : > { %v2509_v40 = vadd.f32 %v2508_v59, %v2495_v42 }
 0x193   : > { %v2522_v18 = vpop.f32.mrf.mxu2  ;;  %v2496_v37 = vpop.f32.mrf.mxu0 }
 0x194   : > { %v2510_v38 = vpop.f32.mrf.mxu1  ;;  %v2536_v45 = vpop.f32.mrf.mxu3  ;;  %v2497_v41 = vadd.f32 %v2496_v37, %v701_v34  ;;  %v2523_v44 = vadd.f32 %v2522_v18, %v2509_v40  ;;  %v5111_v34 = vld [vmem:[%s313_s25] ss:$0 sm:$0xff] }
 0x196   : > { %v2511_v48 = vadd.f32 %v2510_v38, %v2497_v41  ;;  %v2537_v47 = vadd.f32 %v2536_v45, %v2523_v44 }
 0x19b   : > { %v2524_v62 = vpop.f32.mrf.mxu2 }
 0x19c   : > { %v2525_v28 = vadd.f32 %v2524_v62, %v2511_v48  ;;  %v2538_v50 = vpop.f32.mrf.mxu3 }
 0x19e   : > { %v2539_v23 = vadd.f32 %v2538_v50, %v2525_v28 }
 0x1ab   : > { %v2550_v31 = vpop.f32.mrf.mxu0 }
 0x1ac   : > { %v2564_v49 = vpop.f32.mrf.mxu1  ;;  %v2551_v61 = vadd.f32 %v2550_v31, %v2537_v47 }
 0x1ae   : > { %v2565_v3 = vadd.f32 %v2564_v49, %v2551_v61 }
 0x1b0   : > { %v2657_v52 = vmax.f32 %v2565_v3, 0.0 }
 0x1b3   : > { %v2552_v39 = vpop.f32.mrf.mxu0  ;;  %v2578_v6 = vpop.f32.mrf.mxu2 }
 0x1b4   : > { %v2553_v11 = vadd.f32 %v2552_v39, %v2539_v23  ;;  %v2566_v1 = vpop.f32.mrf.mxu1  ;;  %v2592_v56 = vpop.f32.mrf.mxu3  ;;  %v2579_v24 = vadd.f32 %v2578_v6, %v702_v60 }
 0x1b6   : > { %v2567_v53 = vadd.f32 %v2566_v1, %v2553_v11  ;;  %v2593_v9 = vadd.f32 %v2592_v56, %v2579_v24 }
 0x1b8   : > { %v2663_v54 = vmax.f32 %v2567_v53, 0.0 }
 0x1ba   : > { %v2669_v10 = vpack.c.bf16 %v2663_v54, %v2657_v52 }
 0x1bb   : > { %v2580_v32 = vpop.f32.mrf.mxu2 }
 0x1bc   : > { %3123 = vmatmul.bf16.vlgmr.msra.gmra.mxu0 %v2669_v10  ;;  %v2594_v0 = vpop.f32.mrf.mxu3  ;;  %v2581_v63 = vadd.f32 %v2580_v32, %v702_v60 }
 0x1be   : > { %v2595_v15 = vadd.f32 %v2594_v0, %v2581_v63 }
 0x1cb   : > { %v2606_v4 = vpop.f32.mrf.mxu0 }
 0x1cc   : > { %v2620_v8 = vpop.f32.mrf.mxu1  ;;  %v2607_v43 = vadd.f32 %v2606_v4, %v2593_v9 }
 0x1ce   : > { %v2621_v2 = vadd.f32 %v2620_v8, %v2607_v43 }
 0x1d3   : > { %v2634_v12 = vpop.f32.mrf.mxu2  ;;  %v2608_v16 = vpop.f32.mrf.mxu0 }
 0x1d4   : > { %v2648_v13 = vpop.f32.mrf.mxu3  ;;  %v2609_v17 = vadd.f32 %v2608_v16, %v2595_v15  ;;  %v2635_v46 = vadd.f32 %v2634_v12, %v2621_v2  ;;  %v2622_v19 = vpop.f32.mrf.mxu1 }
 0x1d6   : > { %v2623_v20 = vadd.f32 %v2622_v19, %v2609_v17  ;;  %v2649_v5 = vadd.f32 %v2648_v13, %v2635_v46 }
 0x1d8   : > { %v2658_v27 = vmax.f32 %v2649_v5, 0.0 }
 0x1db   : > { %v2636_v14 = vpop.f32.mrf.mxu2 }
 0x1dc   : > { %v2637_v58 = vadd.f32 %v2636_v14, %v2623_v20  ;;  %v2650_v25 = vpop.f32.mrf.mxu3 }
 0x1de   : > { %v2651_v26 = vadd.f32 %v2650_v25, %v2637_v58 }
 0x1e0   : > { %v2664_v7 = vmax.f32 %v2651_v26, 0.0 }
 0x1e2   : > { %v2670_v29 = vpack.c.bf16 %v2664_v7, %v2658_v27 }
 0x1e4   : > { %3137 = vmatmul.bf16.vlgmr.msra.gmra.mxu1 %v2670_v29 }
 0x1eb   : > { %v3068_v59 = vpop.f32.mrf.mxu0 }
 0x1ec   : > { %v3082_v30 = vpop.f32.mrf.mxu1  ;;  %v3069_v42 = vadd.f32 %v5111_v34, %v3068_v59 }
 0x1ee   : > { %v3083_v40 = vadd.f32 %v3082_v30, %v3069_v42 }
 0x1f3   : > { %v3070_v36 = vpop.f32.mrf.mxu0  ;;  %v3096_v18 = vpop.f32.mrf.mxu2 }
 0x1f4   : > { %v3084_v57 = vpop.f32.mrf.mxu1  ;;  %v3097_v45 = vadd.f32 %v3096_v18, %v3083_v40  ;;  %v3071_v41 = vadd.f32 %v5111_v34, %v3070_v36 }
 0x1f6   : > { %v3085_v47 = vadd.f32 %v3084_v57, %v3071_v41 }
 0x1fb   : > { %v3098_v21 = vpop.f32.mrf.mxu2 }
 0x1fc   : > { %v3099_v28 = vadd.f32 %v3098_v21, %v3085_v47 }
 0x207   : > { %v3110_v37 = vpop.f32.mrf.mxu3 }
 0x208   : > { %v3111_v44 = vadd.f32 %v3110_v37, %v3097_v45 }
 0x20f   : > { %v3112_v49 = vpop.f32.mrf.mxu3 }
 0x210   : > { %v3113_v61 = vadd.f32 %v3112_v49, %v3099_v28 }
 0x239   : > { %v3124_v38 = vpop.f32.mrf.mxu0 }
 0x23a   : > { %v3125_v48 = vadd.f32 %v3124_v38, %v3111_v44 }
 0x241   : > { %v3126_v50 = vpop.f32.mrf.mxu0 }
 0x242   : > { %v3127_v23 = vadd.f32 %v3126_v50, %v3113_v61 }
 0x261   : > { %v3138_v62 = vpop.f32.mrf.mxu1 }
 0x262   : > { %v3139_v31 = vadd.f32 %v3138_v62, %v3125_v48 }
 0x264   : > { %v4696_v22 = vmul.f32 -1.442695, %v3139_v31 }
 0x266   : > { %5112 = vpow2.f32 %v4696_v22 }
 0x269   : > { %v3140_v35 = vpop.f32.mrf.mxu1 }
 0x26a   : > { %v3141_v3 = vadd.f32 %v3140_v35, %v3127_v23 }
 0x26c   : > { %v5113_v39 = vpop.eup %5112  ;;  %v4697_v11 = vmul.f32 -1.442695, %v3141_v3 }
 0x26d   : > { %v3149_v1 = vadd.f32 1.0, %v5113_v39 }
 0x26e   : > { %5114 = vpow2.f32 %v4697_v11 }
 0x26f   : > { %5116 = vrcp.f32 %v3149_v1  ;;  %v3162_v10 = vand.u32 2147483648, %v3149_v1  ;;  %v3160_v6 = vand.u32 2147483647, %v3149_v1  ;;  %vm3156_vm1 = vweird.f32 %v3149_v1 }
 0x271   : > { %v3163_v32 = vor.u32 1.1754944e-38, %v3162_v10  ;;  %vm3161_vm4 = vcmp.eq.f32.partialorder %v3160_v6, 8.507059e+37 }
 0x274   : > { %v5115_v51 = vpop.eup %5114 }
 0x275   : > { %v5117_v52 = vpop.eup %5116  ;;  %v3150_v53 = vadd.f32 1.0, %v5115_v51 }
 0x276   : > { %v3152_v54 = vmul.f32 %v5117_v52, %v3149_v1  ;;  %vm3157_vm0 = vweird.f32 %v5117_v52 }
 0x277   : > { %5118 = vrcp.f32 %v3150_v53  ;;  %vm3158_vm2 = vmor %vm3156_vm1, %vm3157_vm0  ;;  %v3177_v9 = vand.u32 2147483648, %v3150_v53  ;;  %v3175_v43 = vand.u32 2147483647, %v3150_v53  ;;  %vm3171_vm6 = vweird.f32 %v3150_v53 }
 0x278   : > { %v3153_v33 = vsub.f32 1.0, %v3152_v54 }
 0x279   : > { %v3178_v13 = vor.u32 1.1754944e-38, %v3177_v9  ;;  %vm3176_vm8 = vcmp.eq.f32.partialorder %v3175_v43, 8.507059e+37 }
 0x27a   : > { %v3154_v55 = vmul.f32 %v5117_v52, %v3153_v33 }
 0x27c   : > { %v3155_v56 = vadd.f32 %v5117_v52, %v3154_v55 }
 0x27d   : > { %v5119_v60 = vpop.eup %5118 }
 0x27e   : > { %v3159_v0 = vsel %vm3158_vm2, %v5117_v52, %v3155_v56  ;;  %v3167_v24 = vmul.f32 %v5119_v60, %v3150_v53  ;;  %vm3172_vm5 = vweird.f32 %v5119_v60 }
 0x27f   : > { %v3164_v4 = vsel %vm3161_vm4, %v3163_v32, %v3159_v0  ;;  %vm3173_vm7 = vmor %vm3171_vm6, %vm3172_vm5 }
 0x280   : > { %3182 = vst.msk [vmem:[%s387_s24] sm:$0xff] %vm3181_vm3, %v3164_v4  ;;  %v3168_v8 = vsub.f32 1.0, %v3167_v24 }
 0x282   : > { %v3169_v63 = vmul.f32 %v5119_v60, %v3168_v8 }
 0x284   : > { %v3170_v12 = vadd.f32 %v5119_v60, %v3169_v63 }
 0x286   : > { %v3174_v15 = vsel %vm3173_vm7, %v5119_v60, %v3170_v12 }
 0x287   : > { %v3179_v16 = vsel %vm3176_vm8, %v3178_v13, %v3174_v15 }
 0x288   : > { %3183 = vst.msk [vmem:[%s387_s24 + $0x8] sm:$0xff] %vm3181_vm3, %v3179_v16 }
 0x289 PF: > { %s21_s23 = sadd.s32 1, %s5264_s23   ;;  %s6265_s21 = sld [smem:[#allocation10_spill]] }
 0x28a   : > { %p18_p1 = scmp.ge.s32.totalorder %s21_s23, 8   ;;  %s6266_s29 = sld [smem:[#allocation9_spill]] }
 0x28b   : > { %s6267_s18 = smov %s5248_s19  ;;  %s6268_s19 = smov %s5252_s20 }
 0x28c   :  { %20 = sbr.rel (!%p18_p1) target bundleno = 8 (0x8), region = 110 }
 0x28f   : > { %s6269_s20 = smov %s6265_s21  ;;  %s6270_s21 = smov %s5260_s22 }
 0x290   : > { %s6271_s22 = smov %s6266_s29 }
 0x291   :  { %3214 = vsyncpa [#allocation3], 1 }
 0x292   :  { %3216 = vsyncpa [#allocation3 + $0x1], 1 }
 0x293   :  { %3217 = vsyncpa [#allocation5], 1 }
 0x294   :  { %3219 = vsyncpa [#allocation5 + $0x1], 1 }

</bundles_post_ra>
